<compile_context>
chip_gen: v7x
topology: tpu7x:2x2x1
jax: 0.10.0
libtpu: 0.0.40
codegen_flags: <defaults>
</compile_context>

<pallas_src>
import math

import jax
import jax.numpy as jnp
from jax import lax
from jax.experimental import pallas as pl
from jax.experimental.pallas import tpu as pltpu


# -----------------------------------------------------------------------------------------
# Fused kernel, one grid step per batch element:
#   1. temporal compression (assumed Conv1d(num_frames -> 1, k=3, pad=1) over the flattened
#      C*H*W axis) on the native (C, HW) layout,
#   2. per-frame single-head attention (num_heads = 1) against res_embeddings,
#   3. 'sum' reduce over frames + residual add of the compressed embeddings.
# TODO(synk): OneD / compress_2 sources were not provided; temporal-conv semantics assumed.
# -----------------------------------------------------------------------------------------
def _spatial_attention_kernel(st_ref, kv_ref, conv_w_ref, conv_b_ref,
                              wq_ref, wk_ref, wv_ref, wo_ref,
                              bq_ref, bk_ref, bv_ref, bo_ref, out_ref):
    Fn, C, HW = st_ref.shape[1], st_ref.shape[2], st_ref.shape[3]

    # ---- temporal compression: frame loop = pure VPU FMA ---------------------------------
    a_left = jnp.zeros((C, HW), jnp.float32)
    a_center = jnp.zeros((C, HW), jnp.float32)
    a_right = jnp.zeros((C, HW), jnp.float32)
    for f in range(Fn):
        xf = st_ref[0, f]                                    # (C, HW) f32
        a_left = a_left + conv_w_ref[3 * f + 0] * xf
        a_center = a_center + conv_w_ref[3 * f + 1] * xf
        a_right = a_right + conv_w_ref[3 * f + 2] * xf

    # Flat +/-1 shifts + boundary masks applied ONCE (shift is linear in the inputs).
    col = lax.broadcasted_iota(jnp.int32, (C, HW), 1)
    row = lax.broadcasted_iota(jnp.int32, (C, HW), 0)
    # value at flattened index l-1 (zero at l == 0)
    left = jnp.roll(a_left, 1, axis=1)
    left = jnp.where(col == 0,
                     jnp.where(row == 0, 0.0, jnp.roll(left, 1, axis=0)),
                     left)
    # value at flattened index l+1 (zero at l == C*HW - 1)
    right = jnp.roll(a_right, -1, axis=1)
    right = jnp.where(col == HW - 1,
                      jnp.where(row == C - 1, 0.0, jnp.roll(right, -1, axis=0)),
                      right)
    comp = left + a_center + right + conv_b_ref[0]           # (C, HW) f32

    # ---- projections for all frames at once (natural MXU orientation throughout) ---------
    comp_bf = comp.astype(jnp.bfloat16)
    kv = kv_ref[0]                                           # (F*C, HW) bf16
    # Q: frames stacked on sublanes; 1/sqrt(C) folded into wq/bq in the wrapper.
    qp_all = (jnp.dot(wq_ref[...], comp_bf,
                      preferred_element_type=jnp.float32)
              + bq_ref[...]).astype(jnp.bfloat16)            # (F*C, HW)
    # K / V: single block-diagonal K=128 matmuls.
    kp_all = jnp.dot(wk_ref[...], kv,
                     preferred_element_type=jnp.float32) + bk_ref[...]   # (F*C, HW) f32
    vp_all = (jnp.dot(wv_ref[...], kv,
                      preferred_element_type=jnp.float32)
              + bv_ref[...]).astype(jnp.bfloat16)            # (F*C, HW)

    # ---- per-frame attention; scores kept transposed so p needs no transpose -------------
    o_blocks = []
    for f in range(Fn):
        sl = slice(f * C, (f + 1) * C)                       # sublane slice, 32-aligned
        qp = qp_all[sl]                                      # (C, HW_q) bf16
        vp = vp_all[sl]                                      # (C, HW_k) bf16
        kp_t = kp_all[sl].T.astype(jnp.bfloat16)             # (HW_k, C)  bf16
        # s_t[k, q] = sum_c kp[c, k] * qp[c, q]
        s_t = jnp.dot(kp_t, qp, preferred_element_type=jnp.float32)      # (HW_k, HW_q)
        s_t = s_t - jnp.max(s_t, axis=0, keepdims=True)
        p_t = jnp.exp(s_t)
        p_t = p_t * pl.reciprocal(jnp.sum(p_t, axis=0, keepdims=True), approx=True)
        # o[c, q] = sum_k vp[c, k] * p_t[k, q]  (no transpose of p)
        o_blocks.append(jnp.dot(vp, p_t.astype(jnp.bfloat16),
                                preferred_element_type=jnp.float32
                                ).astype(jnp.bfloat16))      # (C, HW) bf16

    o_all = jnp.concatenate(o_blocks, axis=0)                # (F*C, HW) bf16
    # Output projection + sum over frames as one lane-dense matmul.
    attn = jnp.dot(wo_ref[...], o_all, preferred_element_type=jnp.float32)   # (C, HW)
    # reduce == 'sum': compress_output + sum_f attention_output_f
    out_ref[0] = (comp + attn + bo_ref[...]).astype(out_ref.dtype)


# -----------------------------------------------------------------------------------------
# Wrapper: native-layout reshapes only; parameter repacking is a handful of tiny one-time
# XLA ops under jit.
# -----------------------------------------------------------------------------------------
def spatial_attention_block(st_embeddings, res_embeddings, params):
    B, F, C, H, W = res_embeddings.shape
    HW = H * W
    scale = 1.0 / math.sqrt(C)   # num_heads = 1 -> head_dim == embed_dim

    # Q weights row-stacked over frames (frames on sublanes), pre-scaled.
    wq_stack = (params["wq"].reshape(F * C, C) * scale).astype(jnp.bfloat16)   # (F*C, C)
    bq_stack = params["bq"].reshape(F * C, 1) * scale                          # (F*C, 1)

    # K / V weights as block-diagonal (F*C, F*C) so each projection is one K=128 matmul.
    def _block_diag(w):                                                        # (F,C,C)->(F*C,F*C)
        bd = jnp.einsum("fij,fg->figj", w, jnp.eye(F, dtype=w.dtype))
        return bd.reshape(F * C, F * C)

    wk_bd = _block_diag(params["wk"]).astype(jnp.bfloat16)                     # (F*C, F*C)
    wv_bd = _block_diag(params["wv"]).astype(jnp.bfloat16)                     # (F*C, F*C)
    bk_stack = params["bk"].reshape(F * C, 1)                                  # (F*C, 1)
    bv_stack = params["bv"].reshape(F * C, 1)                                  # (F*C, 1)

    # O weights frame-stacked along lanes so the frame-sum is a single matmul.
    wo_cat = jnp.concatenate([params["wo"][f] for f in range(F)],
                             axis=-1).astype(jnp.bfloat16)                     # (C, F*C)
    bo_sum = jnp.sum(params["bo"], axis=0).reshape(C, 1)                       # (C, 1)

    conv_w_flat = params["conv_w"].reshape(F * 3)                              # (F*3,)
    conv_b = params["conv_b"]                                                  # (1,)

    # Native layouts: pure reshapes of NCHW data; kv carried as bf16 (only ever used as bf16).
    st = st_embeddings.reshape(B, F, C, HW)
    kv = res_embeddings.reshape(B, F * C, HW).astype(jnp.bfloat16)

    out = pl.pallas_call(
        _spatial_attention_kernel,
        out_shape=jax.ShapeDtypeStruct((B, C, HW), jnp.float32),
        grid=(B,),
        in_specs=[
            pl.BlockSpec((1, F, C, HW), lambda b: (b, 0, 0, 0)),      # st (f32)
            pl.BlockSpec((1, F * C, HW), lambda b: (b, 0, 0)),        # kv (bf16)
            pl.BlockSpec(memory_space=pltpu.MemorySpace.SMEM),        # conv_w (F*3,)
            pl.BlockSpec(memory_space=pltpu.MemorySpace.SMEM),        # conv_b (1,)
            pl.BlockSpec((F * C, C), lambda b: (0, 0)),               # wq_stack
            pl.BlockSpec((F * C, F * C), lambda b: (0, 0)),           # wk_bd
            pl.BlockSpec((F * C, F * C), lambda b: (0, 0)),           # wv_bd
            pl.BlockSpec((C, F * C), lambda b: (0, 0)),               # wo_cat
            pl.BlockSpec((F * C, 1), lambda b: (0, 0)),               # bq_stack
            pl.BlockSpec((F * C, 1), lambda b: (0, 0)),               # bk_stack
            pl.BlockSpec((F * C, 1), lambda b: (0, 0)),               # bv_stack
            pl.BlockSpec((C, 1), lambda b: (0, 0)),                   # bo_sum
        ],
        out_specs=pl.BlockSpec((1, C, HW), lambda b: (b, 0, 0)),
        compiler_params=pltpu.CompilerParams(
            dimension_semantics=("parallel",)),                       # B -> 2 TCs on v7x
    )(st, kv, conv_w_flat, conv_b,
      wq_stack, wk_bd, wv_bd, wo_cat, bq_stack, bk_stack, bv_stack, bo_sum)
    return out.reshape(B, C, H, W)


# -----------------------------------------------------------------------------------------
# Pure-JAX f32 reference (mirrors the PyTorch semantics under the same conv assumption).
# -----------------------------------------------------------------------------------------
def reference(st, res, params):
    B, F, C, H, W = res.shape
    L = C * H * W
    xpad = jnp.pad(st.reshape(B, F, L), ((0, 0), (0, 0), (1, 1)))
    comp = jnp.zeros((B, L), jnp.float32)
    for f in range(F):
        for k in range(3):
            comp = comp + params["conv_w"][f, k] * xpad[:, f, k:k + L]
    comp = (comp + params["conv_b"][0]).reshape(B, C, H, W)

    q = comp.reshape(B, C, H * W).transpose(0, 2, 1)                 # (B, HW, C)
    kv = res.reshape(B, F, C, H * W).transpose(0, 1, 3, 2)           # (B, F, HW, C)
    scale = 1.0 / math.sqrt(C)
    acc = jnp.zeros_like(q)
    for f in range(F):
        qp = q @ params["wq"][f].T + params["bq"][f]
        kp = kv[:, f] @ params["wk"][f].T + params["bk"][f]
        vp = kv[:, f] @ params["wv"][f].T + params["bv"][f]
        s = (qp * scale) @ kp.transpose(0, 2, 1)
        p = jax.nn.softmax(s, axis=-1)
        acc = acc + (p @ vp) @ params["wo"][f].T + params["bo"][f]
    out = acc + q
    return out.transpose(0, 2, 1).reshape(B, C, H, W)


if __name__ == "__main__":
    key = jax.random.PRNGKey(0)
    B, F, C, H, W = 2, 4, 32, 8, 8   # batch, frames, channels (embed_dim), spatial

    keys = jax.random.split(key, 12)
    st = jax.random.normal(keys[0], (B, F, C, H, W), jnp.float32)
    res = jax.random.normal(keys[1], (B, F, C, H, W), jnp.float32)

    def nrm(k, shape, s=0.1):
        return s * jax.random.normal(k, shape, jnp.float32)

    # Deterministic synthetic parameters (shapes implied by nn.MultiheadAttention with
    # embed_dim=C, kdim=vdim=C, num_heads=1, one instance per frame; plus temporal conv).
    params = {
        "conv_w": nrm(keys[2], (F, 3), 0.3),       # Conv1d(F -> 1, k=3) weight
        "conv_b": nrm(keys[3], (1,), 0.1),         # Conv1d bias
        "wq": nrm(keys[4], (F, C, C)),             # per-frame in_proj Q
        "wk": nrm(keys[5], (F, C, C)),             # per-frame in_proj K
        "wv": nrm(keys[6], (F, C, C)),             # per-frame in_proj V
        "wo": nrm(keys[7], (F, C, C)),             # per-frame out_proj weight
        "bq": nrm(keys[8], (F, 1, C)),
        "bk": nrm(keys[9], (F, 1, C)),
        "bv": nrm(keys[10], (F, 1, C)),
        "bo": nrm(keys[11], (F, 1, C)),
    }

    out = jax.jit(spatial_attention_block)(st, res, params)
    out = jax.block_until_ready(out)

    ref = reference(st, res, params)
    assert out.shape == (B, C, H, W), out.shape
    max_err = float(jnp.max(jnp.abs(out - ref)))
    # bf16 MXU operands (f32 accumulation) vs. an all-f32 reference -> bf16-level tolerance.
    assert max_err < 3e-2, f"mismatch vs reference: {max_err}"

    print("KERNEL_OK")
</pallas_src>

<mosaic_0001>
module attributes {stable_mosaic.version = 11 : i64} {
  func.func @_spatial_attention_kernel(%arg0: i32, %arg1: memref<1x4x32x64xf32, #tpu.memory_space<vmem>>, %arg2: memref<1x128x64xbf16, #tpu.memory_space<vmem>>, %arg3: memref<12xf32, #tpu.memory_space<smem>>, %arg4: memref<1xf32, #tpu.memory_space<smem>>, %arg5: memref<128x32xbf16, #tpu.memory_space<vmem>>, %arg6: memref<128x128xbf16, #tpu.memory_space<vmem>>, %arg7: memref<128x128xbf16, #tpu.memory_space<vmem>>, %arg8: memref<32x128xbf16, #tpu.memory_space<vmem>>, %arg9: memref<128x1xf32, #tpu.memory_space<vmem>>, %arg10: memref<128x1xf32, #tpu.memory_space<vmem>>, %arg11: memref<128x1xf32, #tpu.memory_space<vmem>>, %arg12: memref<32x1xf32, #tpu.memory_space<vmem>>, %arg13: memref<1x32x64xf32, #tpu.memory_space<vmem>>) attributes {dimension_semantics = [#tpu.dimension_semantics<parallel>], iteration_bounds = array<i64: 2>, scalar_prefetch = 0 : i64, scratch_operands = 0 : i64, tpu.core_type = #tpu.core_type<tc>, window_params = [{transform_indices = @transform_0, window_bounds = array<i64: 1, 4, 32, 64>}, {transform_indices = @transform_1, window_bounds = array<i64: 1, 128, 64>}, {transform_indices = @transform_2, window_bounds = array<i64: 12>}, {transform_indices = @transform_3, window_bounds = array<i64: 1>}, {pipeline_mode = #tpu.pipeline_mode<synchronous>, transform_indices = @transform_4, window_bounds = array<i64: 128, 32>}, {pipeline_mode = #tpu.pipeline_mode<synchronous>, transform_indices = @transform_5, window_bounds = array<i64: 128, 128>}, {pipeline_mode = #tpu.pipeline_mode<synchronous>, transform_indices = @transform_6, window_bounds = array<i64: 128, 128>}, {pipeline_mode = #tpu.pipeline_mode<synchronous>, transform_indices = @transform_7, window_bounds = array<i64: 32, 128>}, {pipeline_mode = #tpu.pipeline_mode<synchronous>, transform_indices = @transform_8, window_bounds = array<i64: 128, 1>}, {pipeline_mode = #tpu.pipeline_mode<synchronous>, transform_indices = @transform_9, window_bounds = array<i64: 128, 1>}, {pipeline_mode = #tpu.pipeline_mode<synchronous>, transform_indices = @transform_10, window_bounds = array<i64: 128, 1>}, {pipeline_mode = #tpu.pipeline_mode<synchronous>, transform_indices = @transform_11, window_bounds = array<i64: 32, 1>}, {transform_indices = @transform_12, window_bounds = array<i64: 1, 32, 64>}]} {
    %cst = arith.constant 0.000000e+00 : f32
    %0 = vector.broadcast %cst : f32 to vector<32x64xf32>
    %cst_0 = arith.constant 0.000000e+00 : f32
    %1 = vector.broadcast %cst_0 : f32 to vector<32x64xf32>
    %cst_1 = arith.constant 0.000000e+00 : f32
    %2 = vector.broadcast %cst_1 : f32 to vector<32x64xf32>
    %c0 = arith.constant 0 : index
    %c0_2 = arith.constant 0 : index
    %c0_3 = arith.constant 0 : index
    %c0_4 = arith.constant 0 : index
    %3 = vector.load %arg1[%c0, %c0_2, %c0_3, %c0_4] : memref<1x4x32x64xf32, #tpu.memory_space<vmem>>, vector<1x1x32x64xf32>
    %4 = vector.shape_cast %3 : vector<1x1x32x64xf32> to vector<32x64xf32>
    %c0_5 = arith.constant 0 : index
    %5 = memref.load %arg3[%c0_5] : memref<12xf32, #tpu.memory_space<smem>>
    %6 = vector.broadcast %5 : f32 to vector<32x64xf32>
    %7 = arith.mulf %6, %4 : vector<32x64xf32>
    %8 = arith.addf %0, %7 : vector<32x64xf32>
    %c1 = arith.constant 1 : index
    %9 = memref.load %arg3[%c1] : memref<12xf32, #tpu.memory_space<smem>>
    %10 = vector.broadcast %9 : f32 to vector<32x64xf32>
    %11 = arith.mulf %10, %4 : vector<32x64xf32>
    %12 = arith.addf %1, %11 : vector<32x64xf32>
    %c2 = arith.constant 2 : index
    %13 = memref.load %arg3[%c2] : memref<12xf32, #tpu.memory_space<smem>>
    %14 = vector.broadcast %13 : f32 to vector<32x64xf32>
    %15 = arith.mulf %14, %4 : vector<32x64xf32>
    %16 = arith.addf %2, %15 : vector<32x64xf32>
    %c0_6 = arith.constant 0 : index
    %c1_7 = arith.constant 1 : index
    %c0_8 = arith.constant 0 : index
    %c0_9 = arith.constant 0 : index
    %17 = vector.load %arg1[%c0_6, %c1_7, %c0_8, %c0_9] : memref<1x4x32x64xf32, #tpu.memory_space<vmem>>, vector<1x1x32x64xf32>
    %18 = vector.shape_cast %17 : vector<1x1x32x64xf32> to vector<32x64xf32>
    %c3 = arith.constant 3 : index
    %19 = memref.load %arg3[%c3] : memref<12xf32, #tpu.memory_space<smem>>
    %20 = vector.broadcast %19 : f32 to vector<32x64xf32>
    %21 = arith.mulf %20, %18 : vector<32x64xf32>
    %22 = arith.addf %8, %21 : vector<32x64xf32>
    %c4 = arith.constant 4 : index
    %23 = memref.load %arg3[%c4] : memref<12xf32, #tpu.memory_space<smem>>
    %24 = vector.broadcast %23 : f32 to vector<32x64xf32>
    %25 = arith.mulf %24, %18 : vector<32x64xf32>
    %26 = arith.addf %12, %25 : vector<32x64xf32>
    %c5 = arith.constant 5 : index
    %27 = memref.load %arg3[%c5] : memref<12xf32, #tpu.memory_space<smem>>
    %28 = vector.broadcast %27 : f32 to vector<32x64xf32>
    %29 = arith.mulf %28, %18 : vector<32x64xf32>
    %30 = arith.addf %16, %29 : vector<32x64xf32>
    %c0_10 = arith.constant 0 : index
    %c2_11 = arith.constant 2 : index
    %c0_12 = arith.constant 0 : index
    %c0_13 = arith.constant 0 : index
    %31 = vector.load %arg1[%c0_10, %c2_11, %c0_12, %c0_13] : memref<1x4x32x64xf32, #tpu.memory_space<vmem>>, vector<1x1x32x64xf32>
    %32 = vector.shape_cast %31 : vector<1x1x32x64xf32> to vector<32x64xf32>
    %c6 = arith.constant 6 : index
    %33 = memref.load %arg3[%c6] : memref<12xf32, #tpu.memory_space<smem>>
    %34 = vector.broadcast %33 : f32 to vector<32x64xf32>
    %35 = arith.mulf %34, %32 : vector<32x64xf32>
    %36 = arith.addf %22, %35 : vector<32x64xf32>
    %c7 = arith.constant 7 : index
    %37 = memref.load %arg3[%c7] : memref<12xf32, #tpu.memory_space<smem>>
    %38 = vector.broadcast %37 : f32 to vector<32x64xf32>
    %39 = arith.mulf %38, %32 : vector<32x64xf32>
    %40 = arith.addf %26, %39 : vector<32x64xf32>
    %c8 = arith.constant 8 : index
    %41 = memref.load %arg3[%c8] : memref<12xf32, #tpu.memory_space<smem>>
    %42 = vector.broadcast %41 : f32 to vector<32x64xf32>
    %43 = arith.mulf %42, %32 : vector<32x64xf32>
    %44 = arith.addf %30, %43 : vector<32x64xf32>
    %c0_14 = arith.constant 0 : index
    %c3_15 = arith.constant 3 : index
    %c0_16 = arith.constant 0 : index
    %c0_17 = arith.constant 0 : index
    %45 = vector.load %arg1[%c0_14, %c3_15, %c0_16, %c0_17] : memref<1x4x32x64xf32, #tpu.memory_space<vmem>>, vector<1x1x32x64xf32>
    %46 = vector.shape_cast %45 : vector<1x1x32x64xf32> to vector<32x64xf32>
    %c9 = arith.constant 9 : index
    %47 = memref.load %arg3[%c9] : memref<12xf32, #tpu.memory_space<smem>>
    %48 = vector.broadcast %47 : f32 to vector<32x64xf32>
    %49 = arith.mulf %48, %46 : vector<32x64xf32>
    %50 = arith.addf %36, %49 : vector<32x64xf32>
    %c10 = arith.constant 10 : index
    %51 = memref.load %arg3[%c10] : memref<12xf32, #tpu.memory_space<smem>>
    %52 = vector.broadcast %51 : f32 to vector<32x64xf32>
    %53 = arith.mulf %52, %46 : vector<32x64xf32>
    %54 = arith.addf %40, %53 : vector<32x64xf32>
    %c11 = arith.constant 11 : index
    %55 = memref.load %arg3[%c11] : memref<12xf32, #tpu.memory_space<smem>>
    %56 = vector.broadcast %55 : f32 to vector<32x64xf32>
    %57 = arith.mulf %56, %46 : vector<32x64xf32>
    %58 = arith.addf %44, %57 : vector<32x64xf32>
    %59 = tpu.iota {dimensions = array<i32: 1>} : vector<32x64xi32>
    %60 = tpu.iota {dimensions = array<i32: 0>} : vector<32x64xi32>
    %61 = vector.extract_strided_slice %50 {offsets = [0, 63], sizes = [32, 1], strides = [1, 1]} : vector<32x64xf32> to vector<32x1xf32>
    %62 = vector.extract_strided_slice %50 {offsets = [0, 0], sizes = [32, 63], strides = [1, 1]} : vector<32x64xf32> to vector<32x63xf32>
    %63 = tpu.concatenate %61, %62 in 1 : vector<32x1xf32>, vector<32x63xf32> -> vector<32x64xf32>
    %c0_i32 = arith.constant 0 : i32
    %64 = vector.broadcast %c0_i32 : i32 to vector<32x64xi32>
    %65 = arith.cmpi eq, %59, %64 : vector<32x64xi32>
    %c0_i32_18 = arith.constant 0 : i32
    %66 = vector.broadcast %c0_i32_18 : i32 to vector<32x64xi32>
    %67 = arith.cmpi eq, %60, %66 : vector<32x64xi32>
    %68 = vector.extract_strided_slice %63 {offsets = [31, 0], sizes = [1, 64], strides = [1, 1]} : vector<32x64xf32> to vector<1x64xf32>
    %69 = vector.extract_strided_slice %63 {offsets = [0, 0], sizes = [31, 64], strides = [1, 1]} : vector<32x64xf32> to vector<31x64xf32>
    %70 = tpu.concatenate %68, %69 in 0 : vector<1x64xf32>, vector<31x64xf32> -> vector<32x64xf32>
    %cst_19 = arith.constant 0.000000e+00 : f32
    %71 = vector.broadcast %cst_19 : f32 to vector<32x64xf32>
    %72 = arith.select %67, %71, %70 : vector<32x64xi1>, vector<32x64xf32>
    %73 = arith.select %65, %72, %63 : vector<32x64xi1>, vector<32x64xf32>
    %74 = vector.extract_strided_slice %58 {offsets = [0, 1], sizes = [32, 63], strides = [1, 1]} : vector<32x64xf32> to vector<32x63xf32>
    %75 = vector.extract_strided_slice %58 {offsets = [0, 0], sizes = [32, 1], strides = [1, 1]} : vector<32x64xf32> to vector<32x1xf32>
    %76 = tpu.concatenate %74, %75 in 1 : vector<32x63xf32>, vector<32x1xf32> -> vector<32x64xf32>
    %c63_i32 = arith.constant 63 : i32
    %77 = vector.broadcast %c63_i32 : i32 to vector<32x64xi32>
    %78 = arith.cmpi eq, %59, %77 : vector<32x64xi32>
    %c31_i32 = arith.constant 31 : i32
    %79 = vector.broadcast %c31_i32 : i32 to vector<32x64xi32>
    %80 = arith.cmpi eq, %60, %79 : vector<32x64xi32>
    %81 = vector.extract_strided_slice %76 {offsets = [1, 0], sizes = [31, 64], strides = [1, 1]} : vector<32x64xf32> to vector<31x64xf32>
    %82 = vector.extract_strided_slice %76 {offsets = [0, 0], sizes = [1, 64], strides = [1, 1]} : vector<32x64xf32> to vector<1x64xf32>
    %83 = tpu.concatenate %81, %82 in 0 : vector<31x64xf32>, vector<1x64xf32> -> vector<32x64xf32>
    %cst_20 = arith.constant 0.000000e+00 : f32
    %84 = vector.broadcast %cst_20 : f32 to vector<32x64xf32>
    %85 = arith.select %80, %84, %83 : vector<32x64xi1>, vector<32x64xf32>
    %86 = arith.select %78, %85, %76 : vector<32x64xi1>, vector<32x64xf32>
    %87 = arith.addf %73, %54 : vector<32x64xf32>
    %88 = arith.addf %87, %86 : vector<32x64xf32>
    %c0_21 = arith.constant 0 : index
    %89 = memref.load %arg4[%c0_21] : memref<1xf32, #tpu.memory_space<smem>>
    %90 = vector.broadcast %89 : f32 to vector<32x64xf32>
    %91 = arith.addf %88, %90 : vector<32x64xf32>
    %92 = arith.truncf %91 : vector<32x64xf32> to vector<32x64xbf16>
    %c0_22 = arith.constant 0 : index
    %c0_23 = arith.constant 0 : index
    %c0_24 = arith.constant 0 : index
    %93 = vector.load %arg2[%c0_22, %c0_23, %c0_24] : memref<1x128x64xbf16, #tpu.memory_space<vmem>>, vector<1x128x64xbf16>
    %94 = vector.shape_cast %93 : vector<1x128x64xbf16> to vector<128x64xbf16>
    %c0_25 = arith.constant 0 : index
    %c0_26 = arith.constant 0 : index
    %95 = vector.load %arg5[%c0_25, %c0_26] : memref<128x32xbf16, #tpu.memory_space<vmem>>, vector<128x32xbf16>
    %cst_27 = arith.constant dense<0.000000e+00> : vector<128x64xf32>
    %96 = tpu.matmul %95, %92, %cst_27 {dimension_numbers = #tpu.dot_dimension_numbers<[1], [0], [0], [1], [0, 0, 1, 1], [], []>} : vector<128x32xbf16>, vector<32x64xbf16>, vector<128x64xf32> -> vector<128x64xf32>
    %c0_28 = arith.constant 0 : index
    %c0_29 = arith.constant 0 : index
    %97 = vector.load %arg9[%c0_28, %c0_29] : memref<128x1xf32, #tpu.memory_space<vmem>>, vector<128x1xf32>
    %98 = vector.broadcast %97 : vector<128x1xf32> to vector<128x64xf32>
    %99 = arith.addf %96, %98 : vector<128x64xf32>
    %100 = arith.truncf %99 : vector<128x64xf32> to vector<128x64xbf16>
    %c0_30 = arith.constant 0 : index
    %c0_31 = arith.constant 0 : index
    %101 = vector.load %arg6[%c0_30, %c0_31] : memref<128x128xbf16, #tpu.memory_space<vmem>>, vector<128x128xbf16>
    %cst_32 = arith.constant dense<0.000000e+00> : vector<128x64xf32>
    %102 = tpu.matmul %101, %94, %cst_32 {dimension_numbers = #tpu.dot_dimension_numbers<[1], [0], [0], [1], [0, 0, 1, 1], [], []>} : vector<128x128xbf16>, vector<128x64xbf16>, vector<128x64xf32> -> vector<128x64xf32>
    %c0_33 = arith.constant 0 : index
    %c0_34 = arith.constant 0 : index
    %103 = vector.load %arg10[%c0_33, %c0_34] : memref<128x1xf32, #tpu.memory_space<vmem>>, vector<128x1xf32>
    %104 = vector.broadcast %103 : vector<128x1xf32> to vector<128x64xf32>
    %105 = arith.addf %102, %104 : vector<128x64xf32>
    %c0_35 = arith.constant 0 : index
    %c0_36 = arith.constant 0 : index
    %106 = vector.load %arg7[%c0_35, %c0_36] : memref<128x128xbf16, #tpu.memory_space<vmem>>, vector<128x128xbf16>
    %cst_37 = arith.constant dense<0.000000e+00> : vector<128x64xf32>
    %107 = tpu.matmul %106, %94, %cst_37 {dimension_numbers = #tpu.dot_dimension_numbers<[1], [0], [0], [1], [0, 0, 1, 1], [], []>} : vector<128x128xbf16>, vector<128x64xbf16>, vector<128x64xf32> -> vector<128x64xf32>
    %c0_38 = arith.constant 0 : index
    %c0_39 = arith.constant 0 : index
    %108 = vector.load %arg11[%c0_38, %c0_39] : memref<128x1xf32, #tpu.memory_space<vmem>>, vector<128x1xf32>
    %109 = vector.broadcast %108 : vector<128x1xf32> to vector<128x64xf32>
    %110 = arith.addf %107, %109 : vector<128x64xf32>
    %111 = arith.truncf %110 : vector<128x64xf32> to vector<128x64xbf16>
    %112 = vector.extract_strided_slice %100 {offsets = [0, 0], sizes = [32, 64], strides = [1, 1]} : vector<128x64xbf16> to vector<32x64xbf16>
    %113 = vector.extract_strided_slice %111 {offsets = [0, 0], sizes = [32, 64], strides = [1, 1]} : vector<128x64xbf16> to vector<32x64xbf16>
    %114 = vector.extract_strided_slice %105 {offsets = [0, 0], sizes = [32, 64], strides = [1, 1]} : vector<128x64xf32> to vector<32x64xf32>
    %115 = tpu.transpose %114, [1, 0] : vector<32x64xf32> -> vector<64x32xf32>
    %116 = arith.truncf %115 : vector<64x32xf32> to vector<64x32xbf16>
    %cst_40 = arith.constant dense<0.000000e+00> : vector<64x64xf32>
    %117 = tpu.matmul %116, %112, %cst_40 {dimension_numbers = #tpu.dot_dimension_numbers<[1], [0], [0], [1], [0, 0, 1, 1], [], []>} : vector<64x32xbf16>, vector<32x64xbf16>, vector<64x64xf32> -> vector<64x64xf32>
    %cst_41 = arith.constant dense<0xFF800000> : vector<64xf32>
    %118 = vector.multi_reduction <maximumf>, %117, %cst_41 [0] : vector<64x64xf32> to vector<64xf32>
    %119 = vector.shape_cast %118 : vector<64xf32> to vector<1x64xf32>
    %120 = vector.broadcast %119 : vector<1x64xf32> to vector<64x64xf32>
    %121 = arith.subf %117, %120 : vector<64x64xf32>
    %122 = math.exp %121 : vector<64x64xf32>
    %cst_42 = arith.constant dense<0.000000e+00> : vector<64xf32>
    %123 = vector.multi_reduction <add>, %122, %cst_42 [0] : vector<64x64xf32> to vector<64xf32>
    %124 = vector.shape_cast %123 : vector<64xf32> to vector<1x64xf32>
    %125 = tpu.reciprocal %124 {approx = true} : vector<1x64xf32> -> vector<1x64xf32>
    %126 = vector.broadcast %125 : vector<1x64xf32> to vector<64x64xf32>
    %127 = arith.mulf %122, %126 : vector<64x64xf32>
    %128 = arith.truncf %127 : vector<64x64xf32> to vector<64x64xbf16>
    %cst_43 = arith.constant dense<0.000000e+00> : vector<32x64xf32>
    %129 = tpu.matmul %113, %128, %cst_43 {dimension_numbers = #tpu.dot_dimension_numbers<[1], [0], [0], [1], [0, 0, 1, 1], [], []>} : vector<32x64xbf16>, vector<64x64xbf16>, vector<32x64xf32> -> vector<32x64xf32>
    %130 = arith.truncf %129 : vector<32x64xf32> to vector<32x64xbf16>
    %131 = vector.extract_strided_slice %100 {offsets = [32, 0], sizes = [32, 64], strides = [1, 1]} : vector<128x64xbf16> to vector<32x64xbf16>
    %132 = vector.extract_strided_slice %111 {offsets = [32, 0], sizes = [32, 64], strides = [1, 1]} : vector<128x64xbf16> to vector<32x64xbf16>
    %133 = vector.extract_strided_slice %105 {offsets = [32, 0], sizes = [32, 64], strides = [1, 1]} : vector<128x64xf32> to vector<32x64xf32>
    %134 = tpu.transpose %133, [1, 0] : vector<32x64xf32> -> vector<64x32xf32>
    %135 = arith.truncf %134 : vector<64x32xf32> to vector<64x32xbf16>
    %cst_44 = arith.constant dense<0.000000e+00> : vector<64x64xf32>
    %136 = tpu.matmul %135, %131, %cst_44 {dimension_numbers = #tpu.dot_dimension_numbers<[1], [0], [0], [1], [0, 0, 1, 1], [], []>} : vector<64x32xbf16>, vector<32x64xbf16>, vector<64x64xf32> -> vector<64x64xf32>
    %cst_45 = arith.constant dense<0xFF800000> : vector<64xf32>
    %137 = vector.multi_reduction <maximumf>, %136, %cst_45 [0] : vector<64x64xf32> to vector<64xf32>
    %138 = vector.shape_cast %137 : vector<64xf32> to vector<1x64xf32>
    %139 = vector.broadcast %138 : vector<1x64xf32> to vector<64x64xf32>
    %140 = arith.subf %136, %139 : vector<64x64xf32>
    %141 = math.exp %140 : vector<64x64xf32>
    %cst_46 = arith.constant dense<0.000000e+00> : vector<64xf32>
    %142 = vector.multi_reduction <add>, %141, %cst_46 [0] : vector<64x64xf32> to vector<64xf32>
    %143 = vector.shape_cast %142 : vector<64xf32> to vector<1x64xf32>
    %144 = tpu.reciprocal %143 {approx = true} : vector<1x64xf32> -> vector<1x64xf32>
    %145 = vector.broadcast %144 : vector<1x64xf32> to vector<64x64xf32>
    %146 = arith.mulf %141, %145 : vector<64x64xf32>
    %147 = arith.truncf %146 : vector<64x64xf32> to vector<64x64xbf16>
    %cst_47 = arith.constant dense<0.000000e+00> : vector<32x64xf32>
    %148 = tpu.matmul %132, %147, %cst_47 {dimension_numbers = #tpu.dot_dimension_numbers<[1], [0], [0], [1], [0, 0, 1, 1], [], []>} : vector<32x64xbf16>, vector<64x64xbf16>, vector<32x64xf32> -> vector<32x64xf32>
    %149 = arith.truncf %148 : vector<32x64xf32> to vector<32x64xbf16>
    %150 = vector.extract_strided_slice %100 {offsets = [64, 0], sizes = [32, 64], strides = [1, 1]} : vector<128x64xbf16> to vector<32x64xbf16>
    %151 = vector.extract_strided_slice %111 {offsets = [64, 0], sizes = [32, 64], strides = [1, 1]} : vector<128x64xbf16> to vector<32x64xbf16>
    %152 = vector.extract_strided_slice %105 {offsets = [64, 0], sizes = [32, 64], strides = [1, 1]} : vector<128x64xf32> to vector<32x64xf32>
    %153 = tpu.transpose %152, [1, 0] : vector<32x64xf32> -> vector<64x32xf32>
    %154 = arith.truncf %153 : vector<64x32xf32> to vector<64x32xbf16>
    %cst_48 = arith.constant dense<0.000000e+00> : vector<64x64xf32>
    %155 = tpu.matmul %154, %150, %cst_48 {dimension_numbers = #tpu.dot_dimension_numbers<[1], [0], [0], [1], [0, 0, 1, 1], [], []>} : vector<64x32xbf16>, vector<32x64xbf16>, vector<64x64xf32> -> vector<64x64xf32>
    %cst_49 = arith.constant dense<0xFF800000> : vector<64xf32>
    %156 = vector.multi_reduction <maximumf>, %155, %cst_49 [0] : vector<64x64xf32> to vector<64xf32>
    %157 = vector.shape_cast %156 : vector<64xf32> to vector<1x64xf32>
    %158 = vector.broadcast %157 : vector<1x64xf32> to vector<64x64xf32>
    %159 = arith.subf %155, %158 : vector<64x64xf32>
    %160 = math.exp %159 : vector<64x64xf32>
    %cst_50 = arith.constant dense<0.000000e+00> : vector<64xf32>
    %161 = vector.multi_reduction <add>, %160, %cst_50 [0] : vector<64x64xf32> to vector<64xf32>
    %162 = vector.shape_cast %161 : vector<64xf32> to vector<1x64xf32>
    %163 = tpu.reciprocal %162 {approx = true} : vector<1x64xf32> -> vector<1x64xf32>
    %164 = vector.broadcast %163 : vector<1x64xf32> to vector<64x64xf32>
    %165 = arith.mulf %160, %164 : vector<64x64xf32>
    %166 = arith.truncf %165 : vector<64x64xf32> to vector<64x64xbf16>
    %cst_51 = arith.constant dense<0.000000e+00> : vector<32x64xf32>
    %167 = tpu.matmul %151, %166, %cst_51 {dimension_numbers = #tpu.dot_dimension_numbers<[1], [0], [0], [1], [0, 0, 1, 1], [], []>} : vector<32x64xbf16>, vector<64x64xbf16>, vector<32x64xf32> -> vector<32x64xf32>
    %168 = arith.truncf %167 : vector<32x64xf32> to vector<32x64xbf16>
    %169 = vector.extract_strided_slice %100 {offsets = [96, 0], sizes = [32, 64], strides = [1, 1]} : vector<128x64xbf16> to vector<32x64xbf16>
    %170 = vector.extract_strided_slice %111 {offsets = [96, 0], sizes = [32, 64], strides = [1, 1]} : vector<128x64xbf16> to vector<32x64xbf16>
    %171 = vector.extract_strided_slice %105 {offsets = [96, 0], sizes = [32, 64], strides = [1, 1]} : vector<128x64xf32> to vector<32x64xf32>
    %172 = tpu.transpose %171, [1, 0] : vector<32x64xf32> -> vector<64x32xf32>
    %173 = arith.truncf %172 : vector<64x32xf32> to vector<64x32xbf16>
    %cst_52 = arith.constant dense<0.000000e+00> : vector<64x64xf32>
    %174 = tpu.matmul %173, %169, %cst_52 {dimension_numbers = #tpu.dot_dimension_numbers<[1], [0], [0], [1], [0, 0, 1, 1], [], []>} : vector<64x32xbf16>, vector<32x64xbf16>, vector<64x64xf32> -> vector<64x64xf32>
    %cst_53 = arith.constant dense<0xFF800000> : vector<64xf32>
    %175 = vector.multi_reduction <maximumf>, %174, %cst_53 [0] : vector<64x64xf32> to vector<64xf32>
    %176 = vector.shape_cast %175 : vector<64xf32> to vector<1x64xf32>
    %177 = vector.broadcast %176 : vector<1x64xf32> to vector<64x64xf32>
    %178 = arith.subf %174, %177 : vector<64x64xf32>
    %179 = math.exp %178 : vector<64x64xf32>
    %cst_54 = arith.constant dense<0.000000e+00> : vector<64xf32>
    %180 = vector.multi_reduction <add>, %179, %cst_54 [0] : vector<64x64xf32> to vector<64xf32>
    %181 = vector.shape_cast %180 : vector<64xf32> to vector<1x64xf32>
    %182 = tpu.reciprocal %181 {approx = true} : vector<1x64xf32> -> vector<1x64xf32>
    %183 = vector.broadcast %182 : vector<1x64xf32> to vector<64x64xf32>
    %184 = arith.mulf %179, %183 : vector<64x64xf32>
    %185 = arith.truncf %184 : vector<64x64xf32> to vector<64x64xbf16>
    %cst_55 = arith.constant dense<0.000000e+00> : vector<32x64xf32>
    %186 = tpu.matmul %170, %185, %cst_55 {dimension_numbers = #tpu.dot_dimension_numbers<[1], [0], [0], [1], [0, 0, 1, 1], [], []>} : vector<32x64xbf16>, vector<64x64xbf16>, vector<32x64xf32> -> vector<32x64xf32>
    %187 = arith.truncf %186 : vector<32x64xf32> to vector<32x64xbf16>
    %188 = tpu.concatenate %130, %149, %168, %187 in 0 : vector<32x64xbf16>, vector<32x64xbf16>, vector<32x64xbf16>, vector<32x64xbf16> -> vector<128x64xbf16>
    %c0_56 = arith.constant 0 : index
    %c0_57 = arith.constant 0 : index
    %189 = vector.load %arg8[%c0_56, %c0_57] : memref<32x128xbf16, #tpu.memory_space<vmem>>, vector<32x128xbf16>
    %cst_58 = arith.constant dense<0.000000e+00> : vector<32x64xf32>
    %190 = tpu.matmul %189, %188, %cst_58 {dimension_numbers = #tpu.dot_dimension_numbers<[1], [0], [0], [1], [0, 0, 1, 1], [], []>} : vector<32x128xbf16>, vector<128x64xbf16>, vector<32x64xf32> -> vector<32x64xf32>
    %191 = arith.addf %91, %190 : vector<32x64xf32>
    %c0_59 = arith.constant 0 : index
    %c0_60 = arith.constant 0 : index
    %192 = vector.load %arg12[%c0_59, %c0_60] : memref<32x1xf32, #tpu.memory_space<vmem>>, vector<32x1xf32>
    %193 = vector.broadcast %192 : vector<32x1xf32> to vector<32x64xf32>
    %194 = arith.addf %191, %193 : vector<32x64xf32>
    %c0_61 = arith.constant 0 : index
    %c0_62 = arith.constant 0 : index
    %c0_63 = arith.constant 0 : index
    %195 = vector.load %arg13[%c0_61, %c0_62, %c0_63] : memref<1x32x64xf32, #tpu.memory_space<vmem>>, vector<1x32x64xf32>
    %196 = vector.shape_cast %195 : vector<1x32x64xf32> to vector<32x64xf32>
    %197 = vector.shape_cast %194 : vector<32x64xf32> to vector<1x32x64xf32>
    tpu.vector_store %arg13[%c0_61, %c0_62, %c0_63], %197 {strides = array<i32>} : memref<1x32x64xf32, #tpu.memory_space<vmem>>, vector<1x32x64xf32>,
    return
  }
  func.func @transform_0(%arg0: i32) -> (i32, i32, i32, i32) {
    %c0_i32 = arith.constant 0 : i32
    %c0_i32_0 = arith.constant 0 : i32
    %c0_i32_1 = arith.constant 0 : i32
    %c0_i32_2 = arith.constant 0 : i32
    return %arg0, %c0_i32, %c0_i32_0, %c0_i32_1 : i32, i32, i32, i32
  }
  func.func @transform_1(%arg0: i32) -> (i32, i32, i32) {
    %c0_i32 = arith.constant 0 : i32
    %c0_i32_0 = arith.constant 0 : i32
    %c0_i32_1 = arith.constant 0 : i32
    return %arg0, %c0_i32, %c0_i32_0 : i32, i32, i32
  }
  func.func @transform_2(%arg0: i32) -> i32 {
    %c0_i32 = arith.constant 0 : i32
    %c0_i32_0 = arith.constant 0 : i32
    return %c0_i32 : i32
  }
  func.func @transform_3(%arg0: i32) -> i32 {
    %c0_i32 = arith.constant 0 : i32
    %c0_i32_0 = arith.constant 0 : i32
    return %c0_i32 : i32
  }
  func.func @transform_4(%arg0: i32) -> (i32, i32) {
    %c0_i32 = arith.constant 0 : i32
    %c0_i32_0 = arith.constant 0 : i32
    %c0_i32_1 = arith.constant 0 : i32
    return %c0_i32, %c0_i32_0 : i32, i32
  }
  func.func @transform_5(%arg0: i32) -> (i32, i32) {
    %c0_i32 = arith.constant 0 : i32
    %c0_i32_0 = arith.constant 0 : i32
    %c0_i32_1 = arith.constant 0 : i32
    return %c0_i32, %c0_i32_0 : i32, i32
  }
  func.func @transform_6(%arg0: i32) -> (i32, i32) {
    %c0_i32 = arith.constant 0 : i32
    %c0_i32_0 = arith.constant 0 : i32
    %c0_i32_1 = arith.constant 0 : i32
    return %c0_i32, %c0_i32_0 : i32, i32
  }
  func.func @transform_7(%arg0: i32) -> (i32, i32) {
    %c0_i32 = arith.constant 0 : i32
    %c0_i32_0 = arith.constant 0 : i32
    %c0_i32_1 = arith.constant 0 : i32
    return %c0_i32, %c0_i32_0 : i32, i32
  }
  func.func @transform_8(%arg0: i32) -> (i32, i32) {
    %c0_i32 = arith.constant 0 : i32
    %c0_i32_0 = arith.constant 0 : i32
    %c0_i32_1 = arith.constant 0 : i32
    return %c0_i32, %c0_i32_0 : i32, i32
  }
  func.func @transform_9(%arg0: i32) -> (i32, i32) {
    %c0_i32 = arith.constant 0 : i32
    %c0_i32_0 = arith.constant 0 : i32
    %c0_i32_1 = arith.constant 0 : i32
    return %c0_i32, %c0_i32_0 : i32, i32
  }
  func.func @transform_10(%arg0: i32) -> (i32, i32) {
    %c0_i32 = arith.constant 0 : i32
    %c0_i32_0 = arith.constant 0 : i32
    %c0_i32_1 = arith.constant 0 : i32
    return %c0_i32, %c0_i32_0 : i32, i32
  }
  func.func @transform_11(%arg0: i32) -> (i32, i32) {
    %c0_i32 = arith.constant 0 : i32
    %c0_i32_0 = arith.constant 0 : i32
    %c0_i32_1 = arith.constant 0 : i32
    return %c0_i32, %c0_i32_0 : i32, i32
  }
  func.func @transform_12(%arg0: i32) -> (i32, i32, i32) {
    %c0_i32 = arith.constant 0 : i32
    %c0_i32_0 = arith.constant 0 : i32
    %c0_i32_1 = arith.constant 0 : i32
    return %arg0, %c0_i32, %c0_i32_0 : i32, i32, i32
  }
}

</mosaic_0001>

<bundles_post_ra>
// kernel: spatial_attention_block.1
= control target key start
LH: loop header
LB: loop body
LE: loop exit
PB: predicated region body
PF: predicated region fallthrough
CT: control target
= control target key end

     0   :  { %s4384_s0 = inlined_call_operand.vmem [shape: f32[2,4,32,64], index: 0, kind: input, shape index: {}]   ;;  %s4385_s1 = inlined_call_operand.vmem [shape: bf16[2,128,64], index: 1, kind: input, shape index: {}]   ;;  %s4386_s2 = inlined_call_operand.vmem [shape: f32[12], index: 2, kind: input, shape index: {}]   ;;  %s4387_s3 = inlined_call_operand.<no memory space> [shape: f32[1], index: 3, kind: input, shape index: {}]   ;;  %s4388_s4 = inlined_call_operand.vmem [shape: bf16[128,32], index: 4, kind: input, shape index: {}]   ;;  %s4389_s5 = inlined_call_operand.vmem [shape: bf16[128,128], index: 5, kind: input, shape index: {}]   ;;  %s4390_s6 = inlined_call_operand.vmem [shape: bf16[128,128], index: 6, kind: input, shape index: {}]   ;;  %s4391_s7 = inlined_call_operand.vmem [shape: bf16[32,128], index: 7, kind: input, shape index: {}]   ;;  %s4392_s8 = inlined_call_operand.vmem [shape: f32[128,1], index: 8, kind: input, shape index: {}]   ;;  %s4393_s9 = inlined_call_operand.vmem [shape: f32[128,1], index: 9, kind: input, shape index: {}]   ;;  %s4394_s10 = inlined_call_operand.vmem [shape: f32[128,1], index: 10, kind: input, shape index: {}]   ;;  %s4395_s11 = inlined_call_operand.vmem [shape: f32[32,1], index: 11, kind: input, shape index: {}]   ;;  %s4396_s12 = inlined_call_operand.vmem [shape: f32[2,32,64], index: 12, kind: output, shape index: {}]  }
   0x1   :  { %17 = sst [smem:[#allocation2]] %s4387_s3 }
   0x2   :  { %18 = vsyncpa [#allocation4], 0  ;;  %s3442_s23 = smov 0  }
   0x3 LB: > { %s3448_s24 = sadd.s32 4294967295, %s3366_s23   ;;  %p2787_p0 = scmp.ge.s32.totalorder %s3366_s23, 1  ;;  %s3366_s23 = sphi %s3442_s23, %s24_s23  }
   0x4   : > { %p317_p1 = scmp.lt.s32.totalorder %s3366_s23, 3  ;;  %s330_s3 = sshll.u32 %s4386_s2, 4  ;;  %s331_s3 = int_to_ptr.vmem [resolvable:$true] %s330_s3 }
   0x5   : > { %p3216_p3 = scmp.eq.s32.totalorder %s3448_s24, 0  ;;  %s3341_s28 = scalar_lea.vmem %s331_s3, 16 }
   0x6   : > { %p3455_p2 = pnand %p2787_p0, %p317_p1  ;;  %p3342_p6 = scmp.ne.s32.totalorder %s331_s3, %s3341_s28 }
   0x7   : > { %p3349_p10 = scmp.lt.s32.totalorder %s331_s3, %s331_s3  ;;  %p3350_p11 = scmp.lt.s32.totalorder %s3341_s28, %s3341_s28 }
   0x8   : > { %p3212_p4 = pneg %p3455_p2 }
   0x9   : > { %p3351_p12 = por %p3350_p11, %p3349_p10 }
   0xa   : > { %p3213_p5 = pnand %p3216_p3, %p3212_p4 }
   0xc   : > { %p3343_p7 = pneg %p3213_p5 }
   0xe   : > { %p3344_p8 = pnand %p3343_p7, %p3342_p6 }
  0x10   : > { %p3345_p9 = pneg %p3344_p8 }
  0x12   : > { %p3352_p13 = pnand %p3351_p12, %p3345_p9 }
  0x14   : > { %3355 = shalt.err (!%p3352_p13)
}
  0x15   : > { %s3368_s29 = smov [#allocation3]   ;;  %386 = sbr.rel (%p3455_p2) target bundleno = 2168 (0x878), region = 68 }
  0x16   : > { %3215 = dma.vmem_to_smem (!%p3213_p5), %s331_s3, 16, %s3368_s29, [#allocation4]  }
  0x1c   : > { %3361 = dma.done.wait (%p3216_p3), [#allocation4], 16  }
  0x1d   : > { %3363 = vsyncadd (%p3216_p3), [#allocation4], 4294967280 }
  0x1e   : > { %392 = sfence }
  0x1f   : > { %p434_p0 = scmp.lt.s32.totalorder %s3448_s24, 1  ;;  %s454_s30 = sld [smem:[#allocation3]]  ;;  %v3243_v0 = vld [vmem:[%s4389_s5] sm:$0xff]   ;;  %v3369_v3 = vmov 0   ;;  %vm908_vm0 = vcmask 261120   ;;  %vm624_vm1 = vcmask 7168  }
  0x20   : > { %s2798_s15 = sld [smem:[#allocation3 + $0x1]]  ;;  %s2804_s16 = sld [smem:[#allocation3 + $0x3]]  ;;  %3028 = vmatprep.mubr.bf16.mxu1 %v3243_v0  ;;  %3233 = vset.pattern.permute.xlu0 %v3369_v3  ;;  %vm640_vm2 = vcmask 1040384   ;;  %vm688_vm4 = vcmask 515072   ;;  %vm702_vm6 = vcmask 1046528   ;;  %vm1721_vm9 = vcmask 523264  }
  0x21   : > { %s4448_s24 = smov (!%p434_p0, %s3448_s24), 1  ;;  %s2805_s17 = sld [smem:[#allocation3 + $0x4]]  ;;  %3234 = vset.pattern.permute.xlu1 %v3369_v3 }
  0x22   : > { %s2811_s18 = sld [smem:[#allocation3 + $0x6]]  ;;  %s2890_s19 = sshll.u32 %s4448_s24, 6 }
  0x23   : > { %s2889_s20 = sshll.u32 %s4448_s24, 7  ;;  %s3482_s25 = scalar_lea.vmem %s4385_s1, %s2890_s19 }
  0x24   : > { %s3487_s27 = scalar_lea.vmem %s4384_s0, %s2889_s20  ;;  %v3490_v1 = vld [vmem:[%s3482_s25] sm:$0xff]   ;;  %v3495_v4 = vld [vmem:[%s3482_s25 + $0x8] sm:$0xff]   ;;  %s2818_s28 = sld [smem:[#allocation3 + $0x9]]  ;;  %v3517_v14 = vld [vmem:[%s3482_s25 + $0x10] sm:$0xff]  }
  0x25   : > { %v3492_v2 = vstv %s454_s30  ;;  %3012 = vmatprep.subr.bf16.mxu1 %v3490_v1  ;;  %v450_v6 = vld [vmem:[%s3487_s27] sm:$0xff]  ;;  %v3525_v17 = vld [vmem:[%s3487_s27 + $0x18] sm:$0xff]  ;;  %s3540_s29 = sld [smem:[#allocation3 + $0x2]]  ;;  %v3554_v28 = vld [vmem:[%s3487_s27 + $0x8] sm:$0xff]  ;;  %s2806_s30 = sld [smem:[#allocation3 + $0x5]] }
  0x26   : > { %v3497_v5 = vstv %s2798_s15  ;;  %v3502_v7 = vld [vmem:[%s3487_s27 + $0x20] sm:$0xff]  ;;  %v3504_v8 = vstv %s2804_s16  ;;  %3013 = vmatpush3.bf16.msra.mxu1 %v3490_v1  ;;  %v456_v10 = vmul.f32 %v3492_v2, %v450_v6  ;;  %v459_v21 = vmul.f32 %v3492_v2, %v3525_v17  ;;  %v3535_v22 = vld [vmem:[%s3487_s27 + $0x38] sm:$0xff]  ;;  %s3574_s13 = sld [smem:[#allocation3 + $0x8]]  ;;  %s3576_s14 = sld [smem:[#allocation3 + $0xb]] }
  0x27   : > { %v3507_v9 = vld [vmem:[%s3487_s27 + $0x40] sm:$0xff]  ;;  %v466_v11 = vmul.f32 %v3497_v5, %v450_v6  ;;  %v491_v12 = vmul.f32 %v3502_v7, %v3504_v8  ;;  %v3514_v13 = vstv %s2805_s17  ;;  %3014 = vmatprep.subr.bf16.mxu1 %v3495_v4  ;;  %v3538_v23 = vld [vmem:[%s3487_s27 + $0x58] sm:$0xff]  ;;  %v494_v24 = vmul.f32 %v3535_v22, %v3504_v8  ;;  %v3557_v29 = vld [vmem:[%s3487_s27 + $0x28] sm:$0xff]  ;;  %s3578_s15 = sld [smem:[#allocation3 + $0x7]]  ;;  %s3584_s16 = sld [smem:[#allocation3 + $0xa]] }
  0x28   : > { %v501_v15 = vmul.f32 %v3502_v7, %v3514_v13  ;;  %v3522_v16 = vstv %s2811_s18  ;;  %v3530_v20 = vld [vmem:[%s3487_s27 + $0x60] sm:$0xff]  ;;  %v3547_v26 = vld [vmem:[%s3487_s27 + $0x78] sm:$0xff]  ;;  %v457_v33 = vmul.f32 %v3492_v2, %v3554_v28  ;;  %v492_v34 = vmul.f32 %v3557_v29, %v3504_v8  ;;  %v3567_v35 = vld [vmem:[%s3487_s27 + $0x48] sm:$0xff]  ;;  %s3370_s17 = smov 1   ;;  %s3371_s18 = smov 65  }
  0x29   : > { %v495_v18 = vadd.f32 %v491_v12, %v456_v10  ;;  %v526_v19 = vmul.f32 %v3507_v9, %v3522_v16  ;;  %v529_v25 = vmul.f32 %v3538_v23, %v3522_v16  ;;  %v3551_v27 = vld [vmem:[%s3482_s25 + $0x18] sm:$0xff]   ;;  %v498_v32 = vadd.f32 %v494_v24, %v459_v21  ;;  %v3572_v37 = vld [vmem:[%s3487_s27 + $0x68] sm:$0xff]  ;;  %v3590_v43 = vld [vmem:[%s3482_s25 + $0x20] sm:$0xff]   ;;  %s3372_s19 = smov 127   ;;  %s3373_s22 = smov 63  }
  0x2a   : > { %3015 = vmatpush3.bf16.msra.mxu1 %v3495_v4  ;;  %v3559_v30 = vadd.f32 %v501_v15, %v466_v11  ;;  %v3569_v36 = vstv %s2818_s28  ;;  %v496_v41 = vadd.f32 %v492_v34, %v457_v33  ;;  %v527_v42 = vmul.f32 %v3567_v35, %v3522_v16  ;;  %v3593_v44 = vld [vmem:[%s3487_s27 + $0x10] sm:$0xff]  ;;  %v3621_v0 = vld [vmem:[%s3482_s25 + $0x28] sm:$0xff]  }
  0x2b   : > { %v530_v31 = vadd.f32 %v526_v19, %v495_v18  ;;  %3016 = vmatprep.subr.bf16.mxu1 %v3517_v14  ;;  %v561_v38 = vmul.f32 %v3530_v20, %v3569_v36  ;;  %v533_v39 = vadd.f32 %v529_v25, %v498_v32  ;;  %v564_v40 = vmul.f32 %v3547_v26, %v3569_v36  ;;  %v3600_v49 = vld [vmem:[%s3487_s27 + $0x30] sm:$0xff] }
  0x2c   : > { %v562_v47 = vmul.f32 %v3572_v37, %v3569_v36  ;;  %v475_v48 = vstv %s3540_s29  ;;  %v531_v50 = vadd.f32 %v527_v42, %v496_v41  ;;  %v510_v52 = vstv %s2806_s30  ;;  %v2809_v57 = vld [vmem:[%s3487_s27 + $0x50] sm:$0xff] }
  0x2d   : > { %v565_v45 = vadd.f32 %v561_v38, %v530_v31  ;;  %v568_v46 = vadd.f32 %v564_v40, %v533_v39  ;;  %v477_v51 = vmul.f32 %v475_v48, %v3554_v28  ;;  %v476_v53 = vmul.f32 %v475_v48, %v450_v6  ;;  %v2816_v19 = vld [vmem:[%s3487_s27 + $0x70] sm:$0xff] }
  0x2e   : > { %3017 = vmatpush3.bf16.msra.mxu1 %v3517_v14  ;;  %v512_v54 = vmul.f32 %v3557_v29, %v510_v52  ;;  %v511_v55 = vmul.f32 %v3502_v7, %v510_v52  ;;  %v478_v56 = vmul.f32 %v475_v48, %v3593_v44  ;;  %v3611_v58 = vstv %s3574_s13  ;;  %v3642_v32 = vld [vmem:[%s3482_s25 + $0x30] sm:$0xff]   ;;  %s732_s13 = sld [smem:[#allocation2]] }
  0x2f   : > { %3018 = vmatprep.subr.bf16.mxu1 %v3551_v27  ;;  %612 = vrot.lane.b32.xlu1 %v565_v45, %s3370_s17  ;;  %v3614_v59 = vstv %s3576_s14  ;;  %v513_v60 = vmul.f32 %v3600_v49, %v510_v52  ;;  %v547_v62 = vmul.f32 %v3567_v35, %v3611_v58  ;;  %v566_v3 = vadd.f32 %v562_v47, %v531_v50  ;;  %v3663_v50 = vld [vmem:[%s3482_s25 + $0x38] sm:$0xff]   ;;  %s2891_s25 = sshll.u32 %s4448_s24, 5 }
  0x30   : > { %600 = vrot.lane.b32.xlu0 %v565_v45, %s3371_s18  ;;  %v516_v61 = vadd.f32 %v512_v54, %v477_v51  ;;  %v515_v63 = vadd.f32 %v511_v55, %v476_v53  ;;  %v546_v6 = vmul.f32 %v3507_v9, %v3611_v58  ;;  %v548_v10 = vmul.f32 %v2809_v57, %v3611_v58  ;;  %s448_s27 = scalar_lea.vmem %s4396_s12, %s2891_s25 }
  0x31   : > { %v517_v7 = vadd.f32 %v513_v60, %v478_v56  ;;  %v535_v11 = vstv %s3578_s15  ;;  %v582_v15 = vmul.f32 %v3572_v37, %v3614_v59  ;;  %v581_v18 = vmul.f32 %v3530_v20, %v3614_v59 }
  0x32   : > { %3019 = vmatpush3.bf16.msra.mxu1 %v3551_v27  ;;  %v551_v12 = vadd.f32 %v547_v62, %v516_v61  ;;  %v469_v21 = vmul.f32 %v3497_v5, %v3525_v17  ;;  %v550_v24 = vadd.f32 %v546_v6, %v515_v63  ;;  %v570_v25 = vstv %s3584_s16 }
  0x33   : > { %3020 = vmatprep.subr.bf16.mxu1 %v3590_v43  ;;  %618 = vrot.lane.b32.xlu1 %v568_v46, %s3370_s17  ;;  %v504_v31 = vmul.f32 %v3535_v22, %v3514_v13  ;;  %v458_v33 = vmul.f32 %v3492_v2, %v3593_v44  ;;  %v493_v34 = vmul.f32 %v3600_v49, %v3504_v8 }
  0x34   : > { %606 = vrot.lane.b32.xlu0 %v568_v46, %s3371_s18  ;;  %v536_v38 = vmul.f32 %v3507_v9, %v535_v11  ;;  %v539_v39 = vmul.f32 %v3538_v23, %v535_v11  ;;  %v552_v40 = vadd.f32 %v548_v10, %v517_v7  ;;  %v583_v41 = vmul.f32 %v2816_v19, %v3614_v59 }
  0x35   : > { %v586_v42 = vadd.f32 %v582_v15, %v551_v12  ;;  %v585_v45 = vadd.f32 %v581_v18, %v550_v24  ;;  %v467_v2 = vmul.f32 %v3497_v5, %v3554_v28  ;;  %v571_v46 = vmul.f32 %v3530_v20, %v570_v25  ;;  %v1057_v12 = vld [vmem:[%s4393_s9 + $0x18] sm:$0xff]  ;;  %v1056_v15 = vld [vmem:[%s4393_s9 + $0x10] sm:$0xff]  ;;  %v773_v18 = vld [vmem:[%s4392_s8 + $0x8] sm:$0xff] }
  0x36   : > { %3021 = vmatpush3.bf16.msra.mxu1 %v3590_v43  ;;  %v574_v8 = vmul.f32 %v3547_v26, %v570_v25  ;;  %v502_v9 = vmul.f32 %v3557_v29, %v3514_v13  ;;  %v537_v47 = vmul.f32 %v3567_v35, %v535_v11  ;;  %v497_v51 = vadd.f32 %v493_v34, %v458_v33  ;;  %v774_v24 = vld [vmem:[%s4392_s8 + $0x10] sm:$0xff]  ;;  %v1061_v34 = vld [vmem:[%s4393_s9 + $0x38] sm:$0xff] }
  0x37   : > { %3022 = vmatprep.subr.bf16.mxu1 %v3621_v0  ;;  %614 = vrot.lane.b32.xlu1 %v566_v3, %s3370_s17  ;;  %v528_v53 = vmul.f32 %v2809_v57, %v3522_v16  ;;  %v479_v28 = vmul.f32 %v475_v48, %v3525_v17  ;;  %v514_v20 = vmul.f32 %v3535_v22, %v510_v52  ;;  %v1060_v33 = vld [vmem:[%s4393_s9 + $0x30] sm:$0xff] }
  0x38   : > { %602 = vrot.lane.b32.xlu0 %v566_v3, %s3371_s18  ;;  %v506_v54 = vadd.f32 %v502_v9, %v467_v2  ;;  %v572_v55 = vmul.f32 %v3572_v37, %v570_v25  ;;  %v468_v56 = vmul.f32 %v3497_v5, %v3593_v44  ;;  %v503_v29 = vmul.f32 %v3600_v49, %v3514_v13  ;;  %v3244_v13 = vld [vmem:[%s4389_s5 + $0x8] sm:$0xff]   ;;  %v3245_v3 = vld [vmem:[%s4389_s5 + $0x10] sm:$0xff]  }
  0x39   : > { %v587_v35 = vadd.f32 %v583_v41, %v552_v40  ;;  %v538_v16 = vmul.f32 %v2809_v57, %v535_v11  ;;  %v573_v60 = vmul.f32 %v2816_v19, %v570_v25  ;;  %v508_v48 = vadd.f32 %v504_v31, %v469_v21  ;;  %v1055_v11 = vld [vmem:[%s4393_s9 + $0x8] sm:$0xff]  ;;  %v775_v21 = vld [vmem:[%s4392_s8 + $0x18] sm:$0xff]  ;;  %v1058_v25 = vld [vmem:[%s4393_s9 + $0x20] sm:$0xff] }
  0x3a   : > { %3023 = vmatpush3.bf16.msra.mxu1 %v3621_v0  ;;  %v541_v17 = vadd.f32 %v537_v47, %v506_v54  ;;  %v507_v22 = vadd.f32 %v503_v29, %v468_v56  ;;  %v540_v37 = vadd.f32 %v536_v38, %v3559_v30  ;;  %v563_v5 = vmul.f32 %v2816_v19, %v3569_v36  ;;  %v772_v19 = vld [vmem:[%s4392_s8] sm:$0xff]  ;;  %v1059_v31 = vld [vmem:[%s4393_s9 + $0x28] sm:$0xff]  ;;  %v1361_v2 = vld [vmem:[%s4394_s10 + $0x10] sm:$0xff] }
  0x3b   : > { %3024 = vmatprep.subr.bf16.mxu1 %v3642_v32  ;;  %666 = vrot.lane.b32.xlu1 %v586_v42, %s3372_s19  ;;  %v543_v52 = vadd.f32 %v539_v39, %v508_v48  ;;  %v532_v61 = vadd.f32 %v528_v53, %v497_v51  ;;  %v518_v30 = vadd.f32 %v514_v20, %v479_v28  ;;  %v1359_v38 = vld [vmem:[%s4394_s10] sm:$0xff]  ;;  %v3258_v40 = vld [vmem:[%s4389_s5 + $0x28] sm:$0xff]   ;;  %v778_v9 = vld [vmem:[%s4392_s8 + $0x30] sm:$0xff]  ;;  %v589_v29 = vlaneseq }
  0x3c   : > { %664 = vrot.lane.b32.xlu0 %v585_v45, %s3372_s19  ;;  %v3682_v44 = vadd.f32 %v572_v55, %v541_v17  ;;  %v542_v49 = vadd.f32 %v538_v16, %v507_v22  ;;  %v3684_v57 = vadd.f32 %v571_v46, %v540_v37  ;;  %v549_v62 = vmul.f32 %v3538_v23, %v3611_v58  ;;  %v3246_v58 = vld [vmem:[%s4389_s5 + $0x18] sm:$0xff]   ;;  %v3257_v39 = vld [vmem:[%s4389_s5 + $0x20] sm:$0xff]   ;;  %v1360_v41 = vld [vmem:[%s4394_s10 + $0x8] sm:$0xff] }
  0x3d   : > { %v3692_v63 = vadd.f32 %v574_v8, %v543_v52  ;;  %v567_v6 = vadd.f32 %v563_v5, %v532_v61  ;;  %v584_v10 = vmul.f32 %v3547_v26, %v3614_v59  ;;  %v3247_v26 = vld [vmem:[%s4388_s4] sm:$0xff]   ;;  %v1362_v46 = vld [vmem:[%s4394_s10 + $0x18] sm:$0xff]  ;;  %v3261_v8 = vld [vmem:[%s4389_s5 + $0x30] sm:$0xff]   ;;  %v592_v48 = vshrl.u32 %v589_v29, 7 }
  0x3e   : > { %3025 = vmatpush3.bf16.msra.mxu1 %v3642_v32  ;;  %v3690_v36 = vadd.f32 %v573_v60, %v542_v49  ;;  %v553_v7 = vadd.f32 %v549_v62, %v518_v30  ;;  %v1054_v59 = vld [vmem:[%s4393_s9] sm:$0xff]  ;;  %2996 = vmatprep.mubr.msk.bf16.mxu0 %vm908_vm0, %v3247_v26  ;;  %v779_v47 = vld [vmem:[%s4392_s8 + $0x38] sm:$0xff]  ;;  %v3264_v54 = vld [vmem:[%s4390_s6 + $0x28] sm:$0xff]   ;;  %v590_v52 = vand.u32 127, %v589_v29 }
  0x3f   : > { %3026 = vmatprep.subr.bf16.mxu1 %v3663_v50  ;;  %676 = vrot.lane.b32.xlu1 %v585_v45, %s3373_s22  ;;  %v777_v45 = vld [vmem:[%s4392_s8 + $0x28] sm:$0xff]  ;;  %v3262_v51 = vld [vmem:[%s4389_s5 + $0x38] sm:$0xff]   ;;  %v3263_v20 = vld [vmem:[%s4390_s6 + $0x20] sm:$0xff]   ;;  %vm630_vm3 = vcmp.eq.s32.totalorder %v592_v48, 0 }
  0x40   : > { %668 = vrot.lane.b32.xlu0 %v587_v35, %s3372_s19  ;;  %v588_v23 = vadd.f32 %v584_v10, %v553_v7  ;;  %vm629_vm5 = vcmp.eq.s32.totalorder %v590_v52, 0  ;;  %vm693_vm7 = vcmp.eq.s32.totalorder %v590_v52, 63  ;;  %v3250_v52 = vld [vmem:[%s4388_s4 + $0x18] sm:$0xff]  }
  0x42   : > { %3027 = vmatpush3.bf16.msra.mxu1 %v3663_v50 }
  0x43   : > { %3192 = vmatprep.subr.bf16.mxu1 %v3490_v1  ;;  %680 = vrot.lane.b32.xlu1 %v587_v35, %s3373_s22 }
  0x44   : > { %678 = vrot.lane.b32.xlu0 %v586_v42, %s3373_s22  ;;  %v776_v42 = vld [vmem:[%s4392_s8 + $0x20] sm:$0xff] }
  0x45   : > { %3029 = vmatmul.mubr.bf16.vlgmr.msra.gmra.mrb[0].mxu1 %v3244_v13 }
  0x46   : > { %3032 = vmatprep.mubr.bf16.mxu1 %v3245_v3  ;;  %3200 = vmatpush3.bf16.msra.mxu1 %v3490_v1 }
  0x47   : > { %3193 = vmatprep.subr.bf16.mxu1 %v3495_v4  ;;  %616 = vrot.lane.b32.xlu1 %v567_v6, %s3370_s17 }
  0x48   : > { %604 = vrot.lane.b32.xlu0 %v567_v6, %s3371_s18 }
  0x4a   : > { %3201 = vmatpush3.bf16.msra.mxu1 %v3495_v4 }
  0x4b   : > { %3194 = vmatprep.subr.bf16.mxu1 %v3517_v14  ;;  %682 = vrot.lane.b32.xlu1 %v588_v23, %s3373_s22 }
  0x4c   : > { %670 = vrot.lane.b32.xlu0 %v588_v23, %s3372_s19 }
  0x4d   : > { %3033 = vmatmul.mubr.bf16.gmra.mrb[4].mxu1 %v3246_v58 }
  0x4e   : > { %3202 = vmatpush3.bf16.msra.mxu1 %v3517_v14  ;;  %3036 = vmatprep.mubr.bf16.mxu1 %v3257_v39 }
  0x4f   : > { %3195 = vmatprep.subr.bf16.mxu1 %v3551_v27  ;;  %1077 = vperm.xlu1 %3234, %v1055_v11  }
  0x50   : > { %1072 = vperm.xlu0 %3233, %v1054_v59  }
  0x52   : > { %3203 = vmatpush3.bf16.msra.mxu1 %v3551_v27 }
  0x53   : > { %3196 = vmatprep.subr.bf16.mxu1 %v3590_v43  ;;  %1082 = vperm.xlu1 %3234, %v1056_v15  }
  0x54   : > { %1087 = vperm.xlu0 %3233, %v1057_v12  }
  0x55   : > { %3037 = vmatmul.mubr.bf16.gmra.mrb[8].mxu1 %v3258_v40 }
  0x56   : > { %3204 = vmatpush3.bf16.msra.mxu1 %v3590_v43  ;;  %3040 = vmatprep.mubr.bf16.mxu1 %v3261_v8 }
  0x57   : > { %3197 = vmatprep.subr.bf16.mxu1 %v3621_v0  ;;  %790 = vperm.xlu1 %3234, %v772_v19  }
  0x58   : > { %795 = vperm.xlu0 %3233, %v773_v18  }
  0x5a   : > { %3205 = vmatpush3.bf16.msra.mxu1 %v3621_v0 }
  0x5b   : > { %3198 = vmatprep.subr.bf16.mxu1 %v3642_v32  ;;  %800 = vperm.xlu1 %3234, %v774_v24  }
  0x5c   : > { %805 = vperm.xlu0 %3233, %v775_v21  }
  0x5d   : > { %3041 = vmatmul.mubr.bf16.gmra.mrb[12].mxu1 %v3262_v51 }
  0x5e   : > { %3206 = vmatpush3.bf16.msra.mxu1 %v3642_v32  ;;  %3068 = vmatprep.mubr.bf16.mxu1 %v3263_v20 }
  0x5f   : > { %3199 = vmatprep.subr.bf16.mxu1 %v3663_v50 }
  0x60   : > { %1092 = vperm.xlu0 %3233, %v1058_v25  }
  0x62   : > { %3207 = vmatpush3.bf16.msra.mxu1 %v3663_v50 }
  0x64   : > { %1097 = vperm.xlu0 %3233, %v1059_v31  }
  0x65   : > { %3069 = vmatmul.mubr.bf16.vlgmr.msra.gmra.mrb[16].mxu1 %v3264_v54 }
  0x68   : > { %1102 = vperm.xlu0 %3233, %v1060_v33  }
  0x6c   : > { %1107 = vperm.xlu0 %3233, %v1061_v34  }
  0x70   : > { %1377 = vperm.xlu0 %3233, %v1359_v38  }
  0x74   : > { %1382 = vperm.xlu0 %3233, %v1360_v41   ;;  %v733_v41 = vstv %s732_s13 }
  0x78   : > { %810 = vperm.xlu0 %3233, %v776_v42  }
  0x7c   : > { %815 = vperm.xlu0 %3233, %v777_v45  }
  0x80   : > { %1387 = vperm.xlu0 %3233, %v1361_v2   ;;  %v595_v2 = vadd.s32 24, %v592_v48 }
  0x82   : > { %vm697_vm8 = vcmp.eq.s32.totalorder %v595_v2, 31 }
  0x84   : > { %1392 = vperm.xlu0 %3233, %v1362_v46  }
  0x88   : > { %820 = vperm.xlu0 %3233, %v778_v9  }
  0x8c   : > { %825 = vperm.xlu0 %3233, %v779_v47  }
  0xa1   : > { %v613_v53 = vpop.permute.xlu1 %612 }
  0xa2   : > { %v601_v28 = vpop.permute.xlu0 %600 }
  0xa3   : > { %v625_v35 = vsel %vm624_vm1, %v601_v28, %v613_v53 }
  0xa4   : > { %v641_v22 = vrot.slane %v625_v35, 7 }
  0xa5   : > { %v619_v55 = vpop.permute.xlu1 %618 }
  0xa6   : > { %v607_v56 = vpop.permute.xlu0 %606 }
  0xa7   : > { %v628_v16 = vsel %vm624_vm1, %v607_v56, %v619_v55 }
  0xa8   : > { %v635_v37 = vrot.slane %v628_v16, 7 }
  0xa9   : > { %v615_v60 = vpop.permute.xlu1 %614 }
  0xaa   : > { %v603_v17 = vpop.permute.xlu0 %602  ;;  %v651_v30 = vsel %vm640_vm2, %v635_v37, %v641_v22 }
  0xab   : > { %v626_v5 = vsel %vm624_vm1, %v603_v17, %v615_v60  ;;  %v652_v6 = vsel %vm630_vm3, 0.0, %v651_v30  ;;  %v3260_v30 = vld [vmem:[%s4390_s6 + $0x18] sm:$0xff]  }
  0xac   : > { %v642_v61 = vrot.slane %v626_v5, 7  ;;  %v656_v12 = vsel %vm629_vm5, %v652_v6, %v625_v35 }
  0xad   : > { %v667_v13 = vpop.permute.xlu1 %666  ;;  %v724_v34 = vadd.f32 %v656_v12, %v3684_v57 }
  0xae   : > { %v665_v49 = vpop.permute.xlu0 %664  ;;  %v643_v7 = vsel %vm640_vm2, %v641_v22, %v642_v61 }
  0xaf   : > { %v657_v26 = vsel %vm629_vm5, %v643_v7, %v626_v5 }
  0xb0   : > { %v725_v21 = vadd.f32 %v657_v26, %v3682_v44 }
  0xb1   : > { %v677_v62 = vpop.permute.xlu1 %676 }
  0xb2   : > { %v669_v3 = vpop.permute.xlu0 %668  ;;  %v689_v10 = vsel %vm688_vm4, %v665_v49, %v677_v62  ;;  %v3249_v49 = vld [vmem:[%s4388_s4 + $0x10] sm:$0xff]  }
  0xb3   : > { %v703_v15 = vrot.slane %v689_v10, 1 }
  0xb5   : > { %v681_v23 = vpop.permute.xlu1 %680 }
  0xb6   : > { %v679_v58 = vpop.permute.xlu0 %678  ;;  %v691_v59 = vsel %vm688_vm4, %v669_v3, %v681_v23 }
  0xb7   : > { %v690_v11 = vsel %vm688_vm4, %v667_v13, %v679_v58  ;;  %v706_v18 = vrot.slane %v691_v59, 1 }
  0xb8   : > { %v704_v19 = vrot.slane %v690_v11, 1 }
  0xb9   : > { %v617_v31 = vpop.permute.xlu1 %616 }
  0xba   : > { %v705_v24 = vsel %vm702_vm6, %v703_v15, %v704_v19  ;;  %v707_v25 = vsel %vm702_vm6, %v704_v19, %v706_v18  ;;  %v605_v33 = vpop.permute.xlu0 %604 }
  0xbb   : > { %v721_v38 = vsel %vm693_vm7, %v707_v25, %v690_v11  ;;  %v627_v39 = vsel %vm624_vm1, %v605_v33, %v617_v31  ;;  %v720_v40 = vsel %vm693_vm7, %v705_v24, %v689_v10  ;;  %v3265_v33 = vld [vmem:[%s4390_s6 + $0x30] sm:$0xff]  }
  0xbc   : > { %v729_v42 = vadd.f32 %v725_v21, %v721_v38  ;;  %v644_v45 = vrot.slane %v627_v39, 7  ;;  %v728_v46 = vadd.f32 %v724_v34, %v720_v40  ;;  %v3266_v34 = vld [vmem:[%s4390_s6 + $0x38] sm:$0xff]   ;;  %3072 = vmatprep.mubr.bf16.mxu1 %v3265_v33 }
  0xbd   : > { %v683_v9 = vpop.permute.xlu1 %682  ;;  %3073 = vmatmul.mubr.bf16.gmra.mrb[20].mxu1 %v3266_v34 }
  0xbe   : > { %v645_v44 = vsel %vm640_vm2, %v642_v61, %v644_v45  ;;  %v646_v8 = vsel %vm640_vm2, %v644_v45, %v635_v37  ;;  %v671_v47 = vpop.permute.xlu0 %670  ;;  %v3822_v51 = vadd.f32 %v733_v41, %v728_v46  ;;  %v3824_v57 = vadd.f32 %v733_v41, %v729_v42  ;;  %v3251_v61 = vld [vmem:[%s4388_s4 + $0x20] sm:$0xff]  }
  0xbf   : > { %v658_v53 = vsel %vm629_vm5, %v645_v44, %v627_v39  ;;  %v692_v28 = vsel %vm688_vm4, %v671_v47, %v683_v9  ;;  %v659_v20 = vsel %vm629_vm5, %v646_v8, %v628_v16  ;;  %v1062_v44 = vld [vmem:[%s4393_s9 + $0x40] sm:$0xff]  ;;  %v1064_v8 = vld [vmem:[%s4393_s9 + $0x50] sm:$0xff]  ;;  %v1065_v47 = vld [vmem:[%s4393_s9 + $0x58] sm:$0xff] }
  0xc0   : > { %4410 = vst [vmem:[#allocation6_spill] sm:$0xff] %v3822_v51  ;;  %4411 = vst [vmem:[#allocation7_spill] sm:$0xff] %v3824_v57  ;;  %v708_v54 = vrot.slane %v692_v28, 1  ;;  %v738_v55 = vpack.c.bf16 %v3824_v57, %v3822_v51  ;;  %v726_v56 = vadd.f32 %v658_v53, %v3690_v36  ;;  %v727_v60 = vadd.f32 %v659_v20, %v3692_v63  ;;  %v3248_v63 = vld [vmem:[%s4388_s4 + $0x8] sm:$0xff]   ;;  %v1363_v53 = vld [vmem:[%s4394_s10 + $0x20] sm:$0xff] }
  0xc1   : > { %v1063_v20 = vld [vmem:[%s4393_s9 + $0x48] sm:$0xff] }
  0xc2   : > { %v709_v29 = vsel %vm702_vm6, %v706_v18, %v708_v54  ;;  %v715_v35 = vsel %vm702_vm6, %v708_v54, %v703_v15  ;;  %2992 = vmatprep.subr.bf16.mxu0 %v738_v55  ;;  %v780_v54 = vld [vmem:[%s4392_s8 + $0x40] sm:$0xff] }
  0xc3   : > { %v719_v17 = vsel %vm697_vm8, 0.0, %v715_v35  ;;  %2993 = vmatpush3.bf16.msra.mxu0 %v738_v55  ;;  %v722_v22 = vsel %vm693_vm7, %v709_v29, %v691_v59  ;;  %v781_v29 = vld [vmem:[%s4392_s8 + $0x48] sm:$0xff] }
  0xc4   : > { %v723_v16 = vsel %vm693_vm7, %v719_v17, %v692_v28  ;;  %v730_v48 = vadd.f32 %v726_v56, %v722_v22  ;;  %v1364_v28 = vld [vmem:[%s4394_s10 + $0x28] sm:$0xff]  ;;  %v1066_v56 = vld [vmem:[%s4393_s9 + $0x60] sm:$0xff]  ;;  %v1365_v17 = vld [vmem:[%s4394_s10 + $0x30] sm:$0xff] }
  0xc5   : > { %v731_v37 = vadd.f32 %v727_v60, %v723_v16  ;;  %v1067_v35 = vld [vmem:[%s4393_s9 + $0x68] sm:$0xff] }
  0xc6   : > { %v3837_v5 = vadd.f32 %v733_v41, %v730_v48 }
  0xc7   : > { %v3839_v13 = vadd.f32 %v733_v41, %v731_v37  ;;  %v1068_v37 = vld [vmem:[%s4393_s9 + $0x70] sm:$0xff] }
  0xc8   : > { %4412 = vst [vmem:[#allocation8_spill] sm:$0xff] %v3837_v5 }
  0xc9   : > { %4413 = vst [vmem:[#allocation9_spill] sm:$0xff] %v3839_v13  ;;  %v739_v36 = vpack.c.bf16 %v3839_v13, %v3837_v5 }
  0xcb   : > { %2994 = vmatprep.subr.bf16.mxu0 %v739_v36 }
  0xcc   : > { %2995 = vmatpush3.bf16.msra.mxu0 %v739_v36  ;;  %v1366_v36 = vld [vmem:[%s4394_s10 + $0x38] sm:$0xff] }
  0xcd   : > { %3044 = vmatprep.subr.bf16.mxu0 %v3490_v1 }
  0xcf   : > { %2997 = vmatmul.mubr.msk.bf16.vlgmr.msra.gmra.mrb[0].mxu0 %vm908_vm0, %v3248_v63  ;;  %v1069_v63 = vld [vmem:[%s4393_s9 + $0x78] sm:$0xff] }
  0xd0   : > { %3045 = vmatpush3.bf16.msra.mxu0 %v3490_v1  ;;  %3000 = vmatprep.mubr.msk.bf16.mxu0 %vm908_vm0, %v3249_v49  ;;  %v3252_v1 = vld [vmem:[%s4388_s4 + $0x28] sm:$0xff]  }
  0xd1   : > { %3046 = vmatprep.subr.bf16.mxu0 %v3495_v4 }
  0xd4   : > { %3047 = vmatpush3.bf16.msra.mxu0 %v3495_v4  ;;  %v3253_v4 = vld [vmem:[%s4388_s4 + $0x30] sm:$0xff]  }
  0xd5   : > { %3048 = vmatprep.subr.bf16.mxu0 %v3517_v14 }
  0xd7   : > { %3001 = vmatmul.mubr.msk.bf16.gmra.mrb[4].mxu0 %vm908_vm0, %v3250_v52  ;;  %v782_v52 = vld [vmem:[%s4392_s8 + $0x50] sm:$0xff] }
  0xd8   : > { %3049 = vmatpush3.bf16.msra.mxu0 %v3517_v14  ;;  %3004 = vmatprep.mubr.msk.bf16.mxu0 %vm908_vm0, %v3251_v61  ;;  %v3254_v14 = vld [vmem:[%s4388_s4 + $0x38] sm:$0xff]   ;;  %v1367_v61 = vld [vmem:[%s4394_s10 + $0x40] sm:$0xff] }
  0xd9   : > { %3050 = vmatprep.subr.bf16.mxu0 %v3551_v27 }
  0xdc   : > { %3051 = vmatpush3.bf16.msra.mxu0 %v3551_v27  ;;  %v3255_v27 = vld [vmem:[%s4390_s6] sm:$0xff]  }
  0xdd   : > { %3052 = vmatprep.subr.bf16.mxu0 %v3590_v43 }
  0xdf   : > { %3005 = vmatmul.mubr.msk.bf16.gmra.mrb[8].mxu0 %vm908_vm0, %v3252_v1 }
  0xe0   : > { %3053 = vmatpush3.bf16.msra.mxu0 %v3590_v43  ;;  %3008 = vmatprep.mubr.msk.bf16.mxu0 %vm908_vm0, %v3253_v4  ;;  %v3256_v43 = vld [vmem:[%s4390_s6 + $0x8] sm:$0xff]   ;;  %v783_v4 = vld [vmem:[%s4392_s8 + $0x58] sm:$0xff] }
  0xe1   : > { %3054 = vmatprep.subr.bf16.mxu0 %v3621_v0 }
  0xe4   : > { %3055 = vmatpush3.bf16.msra.mxu0 %v3621_v0  ;;  %v3259_v0 = vld [vmem:[%s4390_s6 + $0x10] sm:$0xff]  }
  0xe5   : > { %3056 = vmatprep.subr.bf16.mxu0 %v3642_v32 }
  0xe7   : > { %3009 = vmatmul.mubr.msk.bf16.gmra.mrb[12].mxu0 %vm908_vm0, %v3254_v14 }
  0xe8   : > { %3057 = vmatpush3.bf16.msra.mxu0 %v3642_v32  ;;  %3060 = vmatprep.mubr.bf16.mxu0 %v3255_v27  ;;  %v1073_v32 = vpop.permute.xlu0 %1072 }
  0xe9   : > { %3058 = vmatprep.subr.bf16.mxu0 %v3663_v50 }
  0xec   : > { %3059 = vmatpush3.bf16.msra.mxu0 %v3663_v50  ;;  %v1088_v62 = vpop.permute.xlu0 %1087  ;;  %v1078_v50 = vpop.permute.xlu1 %1077 }
  0xef   : > { %3061 = vmatmul.mubr.bf16.vlgmr.msra.gmra.mrb[16].mxu0 %v3256_v43  ;;  %v1368_v43 = vld [vmem:[%s4394_s10 + $0x48] sm:$0xff] }
  0xf0   : > { %3064 = vmatprep.mubr.bf16.mxu0 %v3259_v0  ;;  %v3899_v3 = vpop.permute.xlu0 %795  ;;  %v1083_v12 = vpop.permute.xlu1 %1082 }
  0xf4   : > { %v3901_v6 = vpop.permute.xlu0 %805 }
  0xf7   : > { %3065 = vmatmul.mubr.bf16.gmra.mrb[20].mxu0 %v3260_v30 }
  0xf8   : > { %v1093_v26 = vpop.permute.xlu0 %1092 }
  0xfc   : > { %v1098_v18 = vpop.permute.xlu0 %1097 }
 0x100   : > { %v1103_v40 = vpop.permute.xlu0 %1102 }
 0x104   : > { %v1108_v42 = vpop.permute.xlu0 %1107 }
 0x108   : > { %v3967_v49 = vpop.permute.xlu0 %1377 }
 0x10c   : > { %v3982_v27 = vpop.permute.xlu0 %1382 }
 0x118   : > { %v3030_v7 = vpop.f32.mrb[0].mxu1 }
 0x119   : > { %v1280_v10 = vpop.f32.mrb[1].mxu1  ;;  %v1289_v21 = vadd.f32 %v3030_v7, %v1083_v12  ;;  %v785_v7 = vld [vmem:[%s4392_s8 + $0x68] sm:$0xff] }
 0x11a   : > { %v1281_v23 = vadd.f32 %v1280_v10, %v1073_v32  ;;  %v3031_v58 = vpop.f32.mrb[2].mxu1  ;;  %v784_v32 = vld [vmem:[%s4392_s8 + $0x60] sm:$0xff] }
 0x11b   : > { %v1283_v59 = vpop.f32.mrb[3].mxu1  ;;  %v1292_v38 = vadd.f32 %v3031_v58, %v1088_v62  ;;  %v811_v62 = vpop.permute.xlu0 %810 }
 0x11c   : > { %1608 = vxpose.xlu1.b32.start [1/4] (short) (narrow) %v1281_v23, 64  ;;  %v1284_v11 = vadd.f32 %v1283_v59, %v1078_v50  ;;  %v1369_v50 = vld [vmem:[%s4394_s10 + $0x50] sm:$0xff]  ;;  %v1370_v23 = vld [vmem:[%s4394_s10 + $0x58] sm:$0xff] }
 0x11d   : > { %v786_v59 = vld [vmem:[%s4392_s8 + $0x70] sm:$0xff] }
 0x11f   : > { %v816_v10 = vpop.permute.xlu0 %815 }
 0x120   : > { %v3034_v15 = vpop.f32.mrb[4].mxu1  ;;  %1609 = vxpose.xlu1.b32.cont [2/4] (short) (narrow) %v1284_v11, 64 }
 0x121   : > { %v1296_v19 = vpop.f32.mrb[5].mxu1  ;;  %v1305_v41 = vadd.f32 %v3034_v15, %v1103_v40 }
 0x122   : > { %v1297_v24 = vadd.f32 %v1296_v19, %v1093_v26  ;;  %v3035_v25 = vpop.f32.mrb[6].mxu1  ;;  %v791_v26 = vpop.permute.xlu1 %790 }
 0x123   : > { %v1299_v31 = vpop.f32.mrb[7].mxu1  ;;  %v1308_v45 = vadd.f32 %v3035_v25, %v1108_v42  ;;  %v4003_v58 = vpop.permute.xlu0 %1387 }
 0x124   : > { %1610 = vxpose.xlu1.b32.cont [3/4] (short) (narrow) %v1289_v21, 64  ;;  %1858 = vxpose.xlu0.b32.start [1/4] (short) (narrow) %v1297_v24, 64  ;;  %v1300_v39 = vadd.f32 %v1299_v31, %v1098_v18 }
 0x126   : > { %v801_v12 = vpop.permute.xlu1 %800 }
 0x127   : > { %v4008_v11 = vpop.permute.xlu0 %1392 }
 0x128   : > { %1611 = vxpose.xlu1.b32.end [4/4] (short) (narrow) %v1292_v38, 64  ;;  %1859 = vxpose.xlu0.b32.cont [2/4] (short) (narrow) %v1300_v39, 64  ;;  %v3909_v2 = vpop.f32.mrb[8].mxu1 }
 0x129   : > { %v3911_v46 = vpop.f32.mrb[9].mxu1 }
 0x12a   : > { %v3919_v9 = vpop.f32.mrb[10].mxu1 }
 0x12b   : > { %v3936_v55 = vpop.f32.mrb[11].mxu1  ;;  %v821_v15 = vpop.permute.xlu0 %820 }
 0x12c   : > { %1860 = vxpose.xlu0.b32.cont [3/4] (short) (narrow) %v1305_v41, 64 }
 0x12f   : > { %v826_v21 = vpop.permute.xlu0 %825 }
 0x130   : > { %1861 = vxpose.xlu0.b32.end [4/4] (short) (narrow) %v1308_v45, 64  ;;  %v3947_v60 = vpop.f32.mrb[12].mxu1 }
 0x131   : > { %v3952_v22 = vpop.f32.mrb[13].mxu1 }
 0x132   : > { %v3954_v16 = vpop.f32.mrb[14].mxu1 }
 0x133   : > { %v3956_v48 = vpop.f32.mrb[15].mxu1 }
 0x138   : > { %v3975_v1 = vpop.f32.mrb[16].mxu1 }
 0x139   : > { %v3980_v14 = vpop.f32.mrb[17].mxu1 }
 0x13a   : > { %v3987_v0 = vpop.f32.mrb[18].mxu1 }
 0x13b   : > { %v3989_v30 = vpop.f32.mrb[19].mxu1 }
 0x156   : > { %1112 = vperm.xlu1 %3234, %v1062_v44  }
 0x15a   : > { %1122 = vperm.xlu1 %3234, %v1064_v8  }
 0x15e   : > { %1127 = vperm.xlu1 %3234, %v1065_v47  }
 0x162   : > { %1397 = vperm.xlu1 %3234, %v1363_v53  }
 0x166   : > { %1402 = vperm.xlu1 %3234, %v1364_v28  }
 0x169   : > { %1117 = vperm.xlu0 %3233, %v1063_v20  }
 0x16a   : > { %830 = vperm.xlu1 %3234, %v780_v54  }
 0x16d   : > { %1132 = vperm.xlu0 %3233, %v1066_v56  }
 0x16e   : > { %835 = vperm.xlu1 %3234, %v781_v29  }
 0x171   : > { %1137 = vperm.xlu0 %3233, %v1067_v35  }
 0x172   : > { %1407 = vperm.xlu1 %3234, %v1365_v17  }
 0x175   : > { %1142 = vperm.xlu0 %3233, %v1068_v37  }
 0x176   : > { %1412 = vperm.xlu1 %3234, %v1366_v36  }
 0x179   : > { %1147 = vperm.xlu0 %3233, %v1069_v63  }
 0x17a   : > { %840 = vperm.xlu1 %3234, %v782_v52  }
 0x17d   : > { %1417 = vperm.xlu0 %3233, %v1367_v61  }
 0x17e   : > { %845 = vperm.xlu1 %3234, %v783_v4  }
 0x181   : > { %1422 = vperm.xlu0 %3233, %v1368_v43  }
 0x185   : > { %850 = vperm.xlu0 %3233, %v784_v32  }
 0x189   : > { %855 = vperm.xlu0 %3233, %v785_v7  }
 0x18d   : > { %1427 = vperm.xlu0 %3233, %v1369_v50  }
 0x191   : > { %1432 = vperm.xlu0 %3233, %v1370_v23  }
 0x195   : > { %860 = vperm.xlu0 %3233, %v786_v59  }
 0x19c   : > { %v1624_v18 = vpop.trf.xlu1 }
 0x1a0   : > { %v1625_v19 = vpop.trf.xlu1 }
 0x1a1   : > { %v1640_v24 = vpack.c.bf16 %v1625_v19, %v1624_v18 }
 0x1a2   : > { %v2998_v25 = vpop.f32.mrb[0].mxu0 }
 0x1a3   : > { %v967_v31 = vpop.f32.mrb[1].mxu0  ;;  %3080 = vmatprep.mubr.msk.bf16.mxu1 %vm908_vm0, %v1640_v24  ;;  %v976_v38 = vadd.f32 %v2998_v25, %v801_v12 }
 0x1a4   : > { %v2999_v33 = vpop.f32.mrb[2].mxu0  ;;  %v1626_v34 = vpop.trf.xlu1  ;;  %v968_v42 = vadd.f32 %v967_v31, %v791_v26 }
 0x1a5   : > { %v979_v39 = vadd.f32 %v2999_v33, %v3901_v6  ;;  %v970_v40 = vpop.f32.mrb[3].mxu0  ;;  %v4012_v41 = vpop.trf.xlu0 }
 0x1a6   : > { %v971_v45 = vadd.f32 %v970_v40, %v3899_v3 }
 0x1a7   : > { %v1031_v44 = vpack.c.bf16 %v979_v39, %v976_v38 }
 0x1a8   : > { %v1030_v8 = vpack.c.bf16 %v971_v45, %v968_v42  ;;  %v1627_v47 = vpop.trf.xlu1 }
 0x1a9   : > { %v4015_v53 = vpop.trf.xlu0  ;;  %v1641_v61 = vpack.c.bf16 %v1627_v47, %v1626_v34 }
 0x1aa   : > { %v3002_v28 = vpop.f32.mrb[4].mxu0  ;;  %3076 = vmatprep.subr.bf16.mxu1 %v1030_v8 }
 0x1ab   : > { %v983_v54 = vpop.f32.mrb[5].mxu0  ;;  %3077 = vmatpush3.bf16.msra.mxu1 %v1030_v8  ;;  %v992_v29 = vadd.f32 %v3002_v28, %v821_v15 }
 0x1ac   : > { %v3003_v56 = vpop.f32.mrb[6].mxu0  ;;  %3078 = vmatprep.subr.bf16.mxu1 %v1031_v44  ;;  %v1628_v6 = vpop.trf.xlu1  ;;  %v984_v3 = vadd.f32 %v983_v54, %v811_v62 }
 0x1ad   : > { %v995_v35 = vadd.f32 %v3003_v56, %v826_v21  ;;  %v986_v17 = vpop.f32.mrb[7].mxu0  ;;  %v4019_v37 = vpop.trf.xlu0 }
 0x1ae   : > { %v987_v36 = vadd.f32 %v986_v17, %v816_v10 }
 0x1af   : > { %v4021_v63 = vpack.c.bf16 %v995_v35, %v992_v29  ;;  %3079 = vmatpush3.bf16.msra.mxu1 %v1031_v44 }
 0x1b0   : > { %v4023_v52 = vpack.c.bf16 %v987_v36, %v984_v3  ;;  %v1629_v4 = vpop.trf.xlu1 }
 0x1b1   : > { %v1642_v43 = vpack.c.bf16 %v1629_v4, %v1628_v6  ;;  %v4025_v32 = vpop.trf.xlu0 }
 0x1b2   : > { %3081 = vmatmul.mubr.msk.bf16.vlgmr.msra.gmra.mrb[24].mxu1 %vm908_vm0, %v1641_v61  ;;  %v4028_v7 = vpop.f32.mrb[8].mxu0 }
 0x1b3   : > { %3084 = vmatprep.mubr.msk.bf16.mxu1 %vm908_vm0, %v1642_v43  ;;  %v999_v62 = vpop.f32.mrb[9].mxu0 }
 0x1b4   : > { %v1630_v10 = vpop.trf.xlu1  ;;  %v4033_v23 = vpop.f32.mrb[10].mxu0 }
 0x1b5   : > { %v1002_v26 = vpop.f32.mrb[11].mxu0  ;;  %v4035_v59 = vpop.trf.xlu0 }
 0x1b8   : > { %v1631_v12 = vpop.trf.xlu1 }
 0x1b9   : > { %v1643_v15 = vpack.c.bf16 %v1631_v12, %v1630_v10  ;;  %v4037_v18 = vpop.trf.xlu0 }
 0x1ba   : > { %v4039_v19 = vpop.f32.mrb[12].mxu0 }
 0x1bb   : > { %v4043_v24 = vpop.f32.mrb[13].mxu0  ;;  %3085 = vmatmul.mubr.msk.bf16.gmra.mrb[28].mxu1 %vm908_vm0, %v1643_v15 }
 0x1bc   : > { %v4046_v25 = vpop.f32.mrb[14].mxu0 }
 0x1bd   : > { %v4048_v31 = vpop.f32.mrb[15].mxu0  ;;  %v4050_v33 = vpop.trf.xlu0 }
 0x1c1   : > { %v4052_v34 = vpop.trf.xlu0 }
 0x1c2   : > { %v3062_v38 = vpop.f32.mrb[16].mxu0 }
 0x1c3   : > { %v1537_v40 = vpop.f32.mrb[17].mxu0  ;;  %v4057_v45 = vadd.f32 %v3062_v38, %v4003_v58 }
 0x1c4   : > { %v3063_v42 = vpop.f32.mrb[18].mxu0  ;;  %v1538_v47 = vadd.f32 %v1537_v40, %v3967_v49 }
 0x1c5   : > { %v4060_v44 = vadd.f32 %v3063_v42, %v4008_v11  ;;  %v1540_v8 = vpop.f32.mrb[19].mxu0 }
 0x1c6   : > { %v1541_v28 = vadd.f32 %v1540_v8, %v3982_v27 }
 0x1c8   : > { %v1600_v56 = vpack.c.bf16 %v1541_v28, %v1538_v47 }
 0x1ca   : > { %3096 = vmatprep.mubr.msk.bf16.mxu0 %vm1721_vm9, %v1600_v56  ;;  %v3066_v6 = vpop.f32.mrb[20].mxu0 }
 0x1cb   : > { %v1553_v29 = vpop.f32.mrb[21].mxu0 }
 0x1cc   : > { %v3067_v35 = vpop.f32.mrb[22].mxu0 }
 0x1cd   : > { %v1556_v58 = vpop.f32.mrb[23].mxu0 }
 0x1d5   : > { %v1113_v17 = vpop.permute.xlu1 %1112 }
 0x1d6   : > { %v1313_v11 = vadd.f32 %v3911_v46, %v1113_v17 }
 0x1d8   : > { %2107 = vxpose.xlu1.b32.start [1/4] (short) (narrow) %v1313_v11, 64 }
 0x1d9   : > { %v1123_v3 = vpop.permute.xlu1 %1122 }
 0x1da   : > { %v1321_v40 = vadd.f32 %v3909_v2, %v1123_v3 }
 0x1dd   : > { %v1128_v36 = vpop.permute.xlu1 %1127 }
 0x1e1   : > { %v1398_v49 = vpop.permute.xlu1 %1397 }
 0x1e2   : > { %v1554_v27 = vadd.f32 %v1553_v29, %v1398_v49  ;;  %v1324_v29 = vadd.f32 %v3919_v9, %v1128_v36 }
 0x1e5   : > { %v1403_v61 = vpop.permute.xlu1 %1402 }
 0x1e6   : > { %v1557_v4 = vadd.f32 %v1556_v58, %v1403_v61 }
 0x1e8   : > { %v1602_v43 = vpack.c.bf16 %v1557_v4, %v1554_v27  ;;  %v1118_v10 = vpop.permute.xlu0 %1117 }
 0x1e9   : > { %v1316_v12 = vadd.f32 %v3936_v55, %v1118_v10  ;;  %v831_v15 = vpop.permute.xlu1 %830 }
 0x1ea   : > { %3120 = vmatprep.mubr.msk.bf16.mxu1 %vm1721_vm9, %v1602_v43  ;;  %v1000_v8 = vadd.f32 %v999_v62, %v831_v15 }
 0x1eb   : > { %2108 = vxpose.xlu1.b32.cont [2/4] (short) (narrow) %v1316_v12, 64 }
 0x1ec   : > { %v1133_v38 = vpop.permute.xlu0 %1132 }
 0x1ed   : > { %v1329_v46 = vadd.f32 %v3952_v22, %v1133_v38  ;;  %v836_v42 = vpop.permute.xlu1 %835 }
 0x1ee   : > { %v1003_v47 = vadd.f32 %v1002_v26, %v836_v42 }
 0x1ef   : > { %2109 = vxpose.xlu1.b32.cont [3/4] (short) (narrow) %v1321_v40, 64  ;;  %2356 = vxpose.xlu0.b32.start [1/4] (short) (narrow) %v1329_v46, 64 }
 0x1f0   : > { %v4072_v28 = vpack.c.bf16 %v1003_v47, %v1000_v8  ;;  %v1138_v56 = vpop.permute.xlu0 %1137 }
 0x1f1   : > { %v1332_v55 = vadd.f32 %v3956_v48, %v1138_v56  ;;  %v1408_v58 = vpop.permute.xlu1 %1407  ;;  %v4084_v48 = vpop.f32.mrb[20].mxu1  ;;  %v2674_v56 = vld [vmem:[%s4395_s11] sm:$0xff] }
 0x1f2   : > { %v4077_v22 = vadd.f32 %v3066_v6, %v1408_v58  ;;  %v4086_v49 = vpop.f32.mrb[21].mxu1  ;;  %v2676_v58 = vld [vmem:[%s4395_s11 + $0x10] sm:$0xff] }
 0x1f3   : > { %2110 = vxpose.xlu1.b32.end [4/4] (short) (narrow) %v1324_v29, 64  ;;  %2357 = vxpose.xlu0.b32.cont [2/4] (short) (narrow) %v1332_v55, 64  ;;  %v4088_v61 = vpop.f32.mrb[22].mxu1  ;;  %v1371_v29 = vld [vmem:[%s4394_s10 + $0x60] sm:$0xff]  ;;  %v2675_v55 = vld [vmem:[%s4395_s11 + $0x8] sm:$0xff] }
 0x1f4   : > { %v1143_v17 = vpop.permute.xlu0 %1142  ;;  %v4090_v6 = vpop.f32.mrb[23].mxu1 }
 0x1f5   : > { %v1337_v2 = vadd.f32 %v3947_v60, %v1143_v17  ;;  %v1413_v11 = vpop.permute.xlu1 %1412  ;;  %v2677_v17 = vld [vmem:[%s4395_s11 + $0x18] sm:$0xff] }
 0x1f6   : > { %v4079_v62 = vadd.f32 %v3067_v35, %v1413_v11 }
 0x1f7   : > { %2358 = vxpose.xlu0.b32.cont [3/4] (short) (narrow) %v1337_v2, 64 }
 0x1f8   : > { %v1148_v3 = vpop.permute.xlu0 %1147 }
 0x1f9   : > { %v1340_v9 = vadd.f32 %v3954_v16, %v1148_v3  ;;  %v841_v36 = vpop.permute.xlu1 %840 }
 0x1fa   : > { %v1008_v27 = vadd.f32 %v4028_v7, %v841_v36 }
 0x1fb   : > { %2359 = vxpose.xlu0.b32.end [4/4] (short) (narrow) %v1340_v9, 64 }
 0x1fc   : > { %v1418_v60 = vpop.permute.xlu0 %1417 }
 0x1fd   : > { %v846_v35 = vpop.permute.xlu1 %845  ;;  %v4097_v16 = vadd.f32 %v3980_v14, %v1418_v60 }
 0x1fe   : > { %v1011_v4 = vadd.f32 %v4033_v23, %v846_v35 }
 0x200   : > { %v4094_v43 = vpack.c.bf16 %v1011_v4, %v1008_v27  ;;  %v1423_v10 = vpop.permute.xlu0 %1422 }
 0x201   : > { %v4100_v12 = vadd.f32 %v3989_v30, %v1423_v10 }
 0x204   : > { %v851_v38 = vpop.permute.xlu0 %850 }
 0x205   : > { %v1016_v40 = vadd.f32 %v4043_v24, %v851_v38  ;;  %v787_v24 = vld [vmem:[%s4392_s8 + $0x78] sm:$0xff] }
 0x208   : > { %v856_v46 = vpop.permute.xlu0 %855 }
 0x209   : > { %v1019_v7 = vadd.f32 %v4048_v31, %v856_v46  ;;  %v1372_v31 = vld [vmem:[%s4394_s10 + $0x68] sm:$0xff] }
 0x20b   : > { %v4106_v42 = vpack.c.bf16 %v1019_v7, %v1016_v40 }
 0x20c   : > { %v1428_v23 = vpop.permute.xlu0 %1427 }
 0x20d   : > { %v4109_v8 = vadd.f32 %v3975_v1, %v1428_v23  ;;  %v1373_v1 = vld [vmem:[%s4394_s10 + $0x70] sm:$0xff] }
 0x210   : > { %v1433_v14 = vpop.permute.xlu0 %1432 }
 0x211   : > { %v4112_v47 = vadd.f32 %v3987_v0, %v1433_v14  ;;  %v1374_v0 = vld [vmem:[%s4394_s10 + $0x78] sm:$0xff] }
 0x214   : > { %v861_v2 = vpop.permute.xlu0 %860 }
 0x221   : > { %865 = vperm.xlu1 %3234, %v787_v24  }
 0x225   : > { %1442 = vperm.xlu1 %3234, %v1372_v31  }
 0x229   : > { %1447 = vperm.xlu1 %3234, %v1373_v1  }
 0x22d   : > { %1452 = vperm.xlu1 %3234, %v1374_v0  }
 0x231   : > { %2680 = vperm.xlu1 %3234, %v2674_v56  }
 0x234   : > { %1437 = vperm.xlu0 %3233, %v1371_v29  }
 0x235   : > { %2685 = vperm.xlu1 %3234, %v2675_v55  }
 0x239   : > { %2690 = vperm.xlu1 %3234, %v2676_v58  }
 0x23d   : > { %2695 = vperm.xlu1 %3234, %v2677_v17  }
 0x267   : > { %v4145_v3 = vpop.trf.xlu1 }
 0x26b   : > { %v4151_v60 = vpop.trf.xlu1 }
 0x26f   : > { %v4143_v11 = vpop.trf.xlu0  ;;  %v4157_v4 = vpop.trf.xlu1 }
 0x270   : > { %4414 = vst [vmem:[#allocation10_spill] sm:$0xff] %v4143_v11 }
 0x273   : > { %v4147_v9 = vpop.trf.xlu0  ;;  %v4163_v40 = vpop.trf.xlu1 }
 0x274   : > { %4415 = vst [vmem:[#allocation11_spill] sm:$0xff] %v4147_v9 }
 0x277   : > { %v4153_v35 = vpop.trf.xlu0  ;;  %v4171_v0 = vpop.trf.xlu1 }
 0x278   : > { %4416 = vst [vmem:[#allocation12_spill] sm:$0xff] %v4153_v35  ;;  %v1024_v35 = vadd.f32 %v4039_v19, %v861_v2 }
 0x27b   : > { %v4155_v27 = vpop.trf.xlu0  ;;  %v4177_v58 = vpop.trf.xlu1 }
 0x27c   : > { %4417 = vst [vmem:[#allocation13_spill] sm:$0xff] %v4155_v27 }
 0x27f   : > { %v4161_v38 = vpop.trf.xlu0  ;;  %v4187_v5 = vpop.trf.xlu1 }
 0x280   : > { %4418 = vst [vmem:[#allocation14_spill] sm:$0xff] %v4161_v38 }
 0x283   : > { %v4165_v46 = vpop.trf.xlu0 }
 0x284   : > { %4419 = vst [vmem:[#allocation15_spill] sm:$0xff] %v4165_v46 }
 0x285   : > { %v3082_v23 = vpop.f32.mrb[24].mxu1 }
 0x286   : > { %v1690_v14 = vpop.f32.mrb[25].mxu1  ;;  %v1724_v17 = vsel %vm1721_vm9, %v3082_v23, -inf }
 0x287   : > { %v3083_v24 = vpop.f32.mrb[26].mxu1  ;;  %v4169_v31 = vpop.trf.xlu0  ;;  %v1722_v36 = vsel %vm1721_vm9, %v1690_v14, -inf }
 0x288   : > { %4420 = vst [vmem:[#allocation16_spill] sm:$0xff] %v4169_v31  ;;  %v1693_v1 = vpop.f32.mrb[27].mxu1  ;;  %v1725_v39 = vsel %vm1721_vm9, %v3083_v24, -inf }
 0x289   : > { %v1723_v20 = vsel %vm1721_vm9, %v1693_v1, -inf }
 0x28b   : > { %v4173_v56 = vpop.trf.xlu0 }
 0x28c   : > { %4421 = vst [vmem:[#allocation17_spill] sm:$0xff] %v4173_v56  ;;  %v4189_v56 = vpop.trf.xlu1 }
 0x28e   : > { %v3086_v55 = vpop.f32.mrb[28].mxu1 }
 0x28f   : > { %v1730_v7 = vsel %vm1721_vm9, %v3086_v55, -inf  ;;  %v1706_v10 = vpop.f32.mrb[29].mxu1 }
 0x290   : > { %v1731_v30 = vmax.f32 %v1724_v17, %v1730_v7  ;;  %v1726_v26 = vsel %vm1721_vm9, %v1706_v10, -inf  ;;  %v3087_v15 = vpop.f32.mrb[30].mxu1 }
 0x291   : > { %v1727_v21 = vmax.f32 %v1722_v36, %v1726_v26  ;;  %v1732_v50 = vsel %vm1721_vm9, %v3087_v15, -inf  ;;  %v1709_v29 = vpop.f32.mrb[31].mxu1 }
 0x292   : > { %v1733_v54 = vmax.f32 %v1725_v39, %v1732_v50  ;;  %v1728_v57 = vsel %vm1721_vm9, %v1709_v29, -inf }
 0x293   : > { %v1729_v13 = vmax.f32 %v1723_v20, %v1728_v57 }
 0x294   : > { %v1735_v51 = vmax.f32 %v1731_v30, %v1733_v54 }
 0x295   : > { %v1734_v31 = vmax.f32 %v1727_v21, %v1729_v13 }
 0x297   : > { %v1736_v7 = vmax.f32 %v1734_v31, %v1735_v51 }
 0x299   : > { %v1737_v17 = vrot.slane %v1736_v7, 4 }
 0x29b   : > { %v1738_v38 = vmax.f32 %v1736_v7, %v1737_v17 }
 0x29d   : > { %v1739_v46 = vrot.slane %v1738_v38, 2 }
 0x29f   : > { %v1740_v26 = vmax.f32 %v1738_v38, %v1739_v46 }
 0x2a0   : > { %v866_v36 = vpop.permute.xlu1 %865 }
 0x2a1   : > { %v1741_v27 = vrot.slane %v1740_v26, 1  ;;  %v1027_v50 = vadd.f32 %v4046_v25, %v866_v36 }
 0x2a3   : > { %v1742_v39 = vmax.f32 %v1740_v26, %v1741_v27  ;;  %v4193_v11 = vpack.c.bf16 %v1027_v50, %v1024_v35 }
 0x2a4   : > { %v1443_v57 = vpop.permute.xlu1 %1442 }
 0x2a5   : > { %v1743_v20 = vsub.f32 %v1690_v14, %v1742_v39  ;;  %v1744_v54 = vsub.f32 %v1693_v1, %v1742_v39  ;;  %v1745_v13 = vsub.f32 %v3082_v23, %v1742_v39  ;;  %v1746_v51 = vsub.f32 %v3083_v24, %v1742_v39 }
 0x2a6   : > { %v1747_v21 = vsub.f32 %v1706_v10, %v1742_v39  ;;  %v1748_v30 = vsub.f32 %v1709_v29, %v1742_v39  ;;  %v1749_v31 = vsub.f32 %v3086_v55, %v1742_v39  ;;  %v1750_v7 = vsub.f32 %v3087_v15, %v1742_v39 }
 0x2a7   : > { %v1751_v17 = vmul.f32 1.442695, %v1743_v20  ;;  %v1753_v38 = vmul.f32 1.442695, %v1744_v54  ;;  %v1755_v46 = vmul.f32 1.442695, %v1745_v13 }
 0x2a8   : > { %v1757_v9 = vmul.f32 1.442695, %v1746_v51  ;;  %v1448_v19 = vpop.permute.xlu1 %1447  ;;  %v1759_v25 = vmul.f32 1.442695, %v1747_v21  ;;  %v1761_v2 = vmul.f32 1.442695, %v1748_v30 }
 0x2a9   : > { %3269 = vpow2.f32 %v1751_v17  ;;  %v4196_v27 = vadd.f32 %v4084_v48, %v1448_v19  ;;  %v1763_v15 = vmul.f32 1.442695, %v1749_v31  ;;  %v1765_v14 = vmul.f32 1.442695, %v1750_v7 }
 0x2aa   : > { %3271 = vpow2.f32 %v1753_v38  ;;  %v4205_v48 = vadd.f32 %v4090_v6, %v1443_v57 }
 0x2ab   : > { %3273 = vpow2.f32 %v1755_v46 }
 0x2ac   : > { %3275 = vpow2.f32 %v1757_v9  ;;  %v1453_v35 = vpop.permute.xlu1 %1452 }
 0x2ad   : > { %v4199_v10 = vadd.f32 %v4088_v61, %v1453_v35  ;;  %3277 = vpow2.f32 %v1759_v25 }
 0x2ae   : > { %3279 = vpow2.f32 %v1761_v2 }
 0x2af   : > { %3281 = vpow2.f32 %v1763_v15 }
 0x2b0   : > { %3283 = vpow2.f32 %v1765_v14 }
 0x2b3   : > { %v3270_v24 = vpop.eup %3269  ;;  %v1438_v1 = vpop.permute.xlu0 %1437 }
 0x2b4   : > { %v3272_v29 = vpop.eup %3271  ;;  %v1767_v9 = vsel %vm1721_vm9, %v3270_v24, 0.0  ;;  %v4208_v61 = vadd.f32 %v4086_v49, %v1438_v1 }
 0x2b5   : > { %v3274_v55 = vpop.eup %3273  ;;  %v1768_v26 = vsel %vm1721_vm9, %v3272_v29, 0.0 }
 0x2b6   : > { %v3276_v36 = vpop.eup %3275  ;;  %v1769_v50 = vadd.f32 %v1768_v26, %v1767_v9  ;;  %v1606_v39 = vpack.c.bf16 %v4205_v48, %v4208_v61  ;;  %v1770_v20 = vsel %vm1721_vm9, %v3274_v55, 0.0 }
 0x2b7   : > { %v3278_v54 = vpop.eup %3277  ;;  %v1772_v51 = vsel %vm1721_vm9, %v3276_v36, 0.0 }
 0x2b8   : > { %v1771_v13 = vadd.f32 %v1770_v20, %v1769_v50  ;;  %v3280_v21 = vpop.eup %3279  ;;  %v1774_v57 = vsel %vm1721_vm9, %v3278_v54, 0.0 }
 0x2b9   : > { %v3282_v49 = vpop.eup %3281  ;;  %v1776_v31 = vsel %vm1721_vm9, %v3280_v21, 0.0 }
 0x2ba   : > { %v1773_v6 = vadd.f32 %v1772_v51, %v1771_v13  ;;  %v3284_v7 = vpop.eup %3283  ;;  %v1778_v38 = vsel %vm1721_vm9, %v3282_v49, 0.0 }
 0x2bb   : > { %v1780_v19 = vsel %vm1721_vm9, %v3284_v7, 0.0 }
 0x2bc   : > { %v1775_v30 = vadd.f32 %v1774_v57, %v1773_v6 }
 0x2be   : > { %v1777_v17 = vadd.f32 %v1776_v31, %v1775_v30 }
 0x2c0   : > { %v1779_v46 = vadd.f32 %v1778_v38, %v1777_v17 }
 0x2c2   : > { %v1781_v25 = vadd.f32 %v1780_v19, %v1779_v46 }
 0x2c4   : > { %v1782_v2 = vrot.slane %v1781_v25, 4 }
 0x2c6   : > { %v1783_v35 = vadd.f32 %v1782_v2, %v1781_v25 }
 0x2c8   : > { %v1784_v15 = vrot.slane %v1783_v35, 2 }
 0x2ca   : > { %v1785_v14 = vadd.f32 %v1784_v15, %v1783_v35 }
 0x2cc   : > { %v1786_v1 = vrot.slane %v1785_v14, 1 }
 0x2ce   : > { %v1787_v9 = vadd.f32 %v1786_v1, %v1785_v14 }
 0x2d0   : > { %3285 = vrcp.f32 %v1787_v9 }
 0x2da   : > { %v3286_v26 = vpop.eup %3285 }
 0x2db   : > { %v1789_v50 = vmul.f32 %v3286_v26, %v3270_v24  ;;  %v1790_v20 = vmul.f32 %v3286_v26, %v3272_v29  ;;  %v1791_v13 = vmul.f32 %v3286_v26, %v3274_v55  ;;  %v1792_v51 = vmul.f32 %v3286_v26, %v3276_v36 }
 0x2dc   : > { %v1793_v6 = vmul.f32 %v3286_v26, %v3278_v54  ;;  %v1794_v57 = vmul.f32 %v3286_v26, %v3280_v21  ;;  %v1795_v30 = vmul.f32 %v3286_v26, %v3282_v49  ;;  %v1796_v31 = vmul.f32 %v3286_v26, %v3284_v7 }
 0x2dd   : > { %v1797_v17 = vpack.c.bf16 %v1790_v20, %v1789_v50  ;;  %v1798_v38 = vpack.c.bf16 %v1792_v51, %v1791_v13  ;;  %v4422_v24 = vpack.c.bf16 %v4060_v44, %v4057_v45  ;;  %v4423_v29 = vpack.c.bf16 %v4015_v53, %v4012_v41 }
 0x2de   : > { %v1799_v23 = vpack.c.bf16 %v1794_v57, %v1793_v6  ;;  %v1800_v46 = vpack.c.bf16 %v1796_v31, %v1795_v30  ;;  %v4425_v45 = vpack.c.bf16 %v4037_v18, %v4035_v59  ;;  %v4427_v41 = vpack.c.bf16 %v4100_v12, %v4097_v16 }
 0x2df   : > { %3088 = vmatprep.subr.bf16.mxu0 %v1797_v17 }
 0x2e0   : > { %3089 = vmatpush3.bf16.msra.mxu0 %v1797_v17 }
 0x2e1   : > { %3090 = vmatprep.subr.bf16.mxu0 %v1798_v38 }
 0x2e4   : > { %3091 = vmatpush3.bf16.msra.mxu0 %v1798_v38 }
 0x2e5   : > { %3092 = vmatprep.subr.bf16.mxu0 %v1799_v23 }
 0x2e8   : > { %3093 = vmatpush3.bf16.msra.mxu0 %v1799_v23  ;;  %v4424_v23 = vpack.c.bf16 %v4025_v32, %v4019_v37 }
 0x2e9   : > { %3094 = vmatprep.subr.bf16.mxu0 %v1800_v46 }
 0x2ec   : > { %3095 = vmatpush3.bf16.msra.mxu0 %v1800_v46 }
 0x2ed   : > { %3100 = vmatprep.subr.bf16.mxu0 %v4023_v52 }
 0x2ef   : > { %3097 = vmatmul.mubr.msk.bf16.vlgmr.msra.gmra.mrb[24].mxu0 %vm1721_vm9, %v4422_v24 }
 0x2f0   : > { %3101 = vmatpush3.bf16.msra.mxu0 %v4023_v52  ;;  %3104 = vmatprep.mubr.msk.bf16.mxu0 %vm908_vm0, %v4423_v29  ;;  %v4426_v52 = vpack.c.bf16 %v4052_v34, %v4050_v33 }
 0x2f1   : > { %3102 = vmatprep.subr.bf16.mxu0 %v4021_v63 }
 0x2f4   : > { %3103 = vmatpush3.bf16.msra.mxu0 %v4021_v63 }
 0x2f7   : > { %3105 = vmatmul.mubr.msk.bf16.vlgmr.msra.gmra.mrb[28].mxu0 %vm908_vm0, %v4424_v23 }
 0x2f8   : > { %3108 = vmatprep.mubr.msk.bf16.mxu0 %vm908_vm0, %v4425_v45 }
 0x2ff   : > { %3109 = vmatmul.mubr.msk.bf16.gmra.mrb[32].mxu0 %vm908_vm0, %v4426_v52 }
 0x300   : > { %3144 = vmatprep.mubr.msk.bf16.mxu0 %vm1721_vm9, %v4427_v41 }
 0x3c2   : > { %v3098_v53 = vpop.f32.mrb[24].mxu0 }
 0x3c3   : > { %v1841_v63 = vpop.f32.mrb[25].mxu0 }
 0x3c4   : > { %v3099_v37 = vpop.f32.mrb[26].mxu0 }
 0x3c5   : > { %v4247_v32 = vpack.c.bf16 %v3099_v37, %v3098_v53  ;;  %v1844_v44 = vpop.f32.mrb[27].mxu0 }
 0x3c6   : > { %v4249_v55 = vpack.c.bf16 %v1844_v44, %v1841_v63 }
 0x3ca   : > { %v3106_v59 = vpop.f32.mrb[28].mxu0 }
 0x3cb   : > { %v1940_v18 = vpop.f32.mrb[29].mxu0  ;;  %v1973_v34 = vsel %vm1721_vm9, %v3106_v59, -inf }
 0x3cc   : > { %v3107_v36 = vpop.f32.mrb[30].mxu0  ;;  %v1971_v12 = vsel %vm1721_vm9, %v1940_v18, -inf }
 0x3cd   : > { %v1943_v54 = vpop.f32.mrb[31].mxu0  ;;  %v1974_v25 = vsel %vm1721_vm9, %v3107_v36, -inf }
 0x3ce   : > { %v1972_v14 = vsel %vm1721_vm9, %v1943_v54, -inf }
 0x3d2   : > { %v3110_v33 = vpop.f32.mrb[32].mxu0 }
 0x3d3   : > { %v1979_v21 = vsel %vm1721_vm9, %v3110_v33, -inf  ;;  %v1956_v16 = vpop.f32.mrb[33].mxu0 }
 0x3d4   : > { %v1980_v49 = vmax.f32 %v1973_v34, %v1979_v21  ;;  %v1975_v7 = vsel %vm1721_vm9, %v1956_v16, -inf  ;;  %v3111_v19 = vpop.f32.mrb[34].mxu0 }
 0x3d5   : > { %v1976_v2 = vmax.f32 %v1971_v12, %v1975_v7  ;;  %v1981_v35 = vsel %vm1721_vm9, %v3111_v19, -inf  ;;  %v1959_v15 = vpop.f32.mrb[35].mxu0 }
 0x3d6   : > { %v1982_v1 = vmax.f32 %v1974_v25, %v1981_v35  ;;  %v1977_v9 = vsel %vm1721_vm9, %v1959_v15, -inf }
 0x3d7   : > { %v1978_v26 = vmax.f32 %v1972_v14, %v1977_v9 }
 0x3d8   : > { %v1984_v50 = vmax.f32 %v1980_v49, %v1982_v1 }
 0x3d9   : > { %v1983_v20 = vmax.f32 %v1976_v2, %v1978_v26 }
 0x3db   : > { %v1985_v13 = vmax.f32 %v1983_v20, %v1984_v50 }
 0x3dd   : > { %v1986_v51 = vrot.slane %v1985_v13, 4 }
 0x3df   : > { %v1987_v6 = vmax.f32 %v1985_v13, %v1986_v51 }
 0x3e1   : > { %v1988_v57 = vrot.slane %v1987_v6, 2 }
 0x3e3   : > { %v1989_v30 = vmax.f32 %v1987_v6, %v1988_v57 }
 0x3e5   : > { %v1990_v31 = vrot.slane %v1989_v30, 1 }
 0x3e7   : > { %v1991_v17 = vmax.f32 %v1989_v30, %v1990_v31 }
 0x3e9   : > { %v1992_v38 = vsub.f32 %v1940_v18, %v1991_v17  ;;  %v1993_v46 = vsub.f32 %v1943_v54, %v1991_v17  ;;  %v1994_v24 = vsub.f32 %v3106_v59, %v1991_v17  ;;  %v1995_v29 = vsub.f32 %v3107_v36, %v1991_v17 }
 0x3ea   : > { %v1996_v23 = vsub.f32 %v1956_v16, %v1991_v17  ;;  %v1997_v45 = vsub.f32 %v1959_v15, %v1991_v17  ;;  %v1998_v52 = vsub.f32 %v3110_v33, %v1991_v17  ;;  %v1999_v41 = vsub.f32 %v3111_v19, %v1991_v17 }
 0x3eb   : > { %v2000_v53 = vmul.f32 1.442695, %v1992_v38  ;;  %v2002_v63 = vmul.f32 1.442695, %v1993_v46  ;;  %v2004_v37 = vmul.f32 1.442695, %v1994_v24 }
 0x3ec   : > { %v2006_v44 = vmul.f32 1.442695, %v1995_v29  ;;  %v2008_v34 = vmul.f32 1.442695, %v1996_v23  ;;  %v2010_v21 = vmul.f32 1.442695, %v1997_v45 }
 0x3ed   : > { %3287 = vpow2.f32 %v2000_v53  ;;  %v2012_v12 = vmul.f32 1.442695, %v1998_v52  ;;  %v2014_v18 = vmul.f32 1.442695, %v1999_v41 }
 0x3ee   : > { %3289 = vpow2.f32 %v2002_v63 }
 0x3ef   : > { %3291 = vpow2.f32 %v2004_v37 }
 0x3f0   : > { %3293 = vpow2.f32 %v2006_v44 }
 0x3f1   : > { %3295 = vpow2.f32 %v2008_v34 }
 0x3f2   : > { %3297 = vpow2.f32 %v2010_v21 }
 0x3f3   : > { %3299 = vpow2.f32 %v2012_v12 }
 0x3f4   : > { %3301 = vpow2.f32 %v2014_v18 }
 0x3f7   : > { %v3288_v59 = vpop.eup %3287 }
 0x3f8   : > { %v3290_v36 = vpop.eup %3289  ;;  %v2016_v54 = vsel %vm1721_vm9, %v3288_v59, 0.0 }
 0x3f9   : > { %v3292_v33 = vpop.eup %3291  ;;  %v2017_v16 = vsel %vm1721_vm9, %v3290_v36, 0.0 }
 0x3fa   : > { %v3294_v49 = vpop.eup %3293  ;;  %v2018_v7 = vadd.f32 %v2017_v16, %v2016_v54  ;;  %v2019_v19 = vsel %vm1721_vm9, %v3292_v33, 0.0  ;;  %v2141_v16 = vpack.c.bf16 %v4177_v58, %v4171_v0 }
 0x3fb   : > { %v3296_v25 = vpop.eup %3295  ;;  %v2021_v35 = vsel %vm1721_vm9, %v3294_v49, 0.0 }
 0x3fc   : > { %v2020_v2 = vadd.f32 %v2019_v19, %v2018_v7  ;;  %v3298_v15 = vpop.eup %3297  ;;  %v2023_v1 = vsel %vm1721_vm9, %v3296_v25, 0.0 }
 0x3fd   : > { %v3300_v9 = vpop.eup %3299  ;;  %v2025_v50 = vsel %vm1721_vm9, %v3298_v15, 0.0 }
 0x3fe   : > { %v2022_v14 = vadd.f32 %v2021_v35, %v2020_v2  ;;  %v3302_v20 = vpop.eup %3301  ;;  %v2027_v51 = vsel %vm1721_vm9, %v3300_v9, 0.0 }
 0x3ff   : > { %v2029_v57 = vsel %vm1721_vm9, %v3302_v20, 0.0 }
 0x400   : > { %v2024_v26 = vadd.f32 %v2023_v1, %v2022_v14 }
 0x402   : > { %v2026_v13 = vadd.f32 %v2025_v50, %v2024_v26 }
 0x404   : > { %v2028_v6 = vadd.f32 %v2027_v51, %v2026_v13 }
 0x406   : > { %v2030_v30 = vadd.f32 %v2029_v57, %v2028_v6 }
 0x408   : > { %v2031_v31 = vrot.slane %v2030_v30, 4 }
 0x40a   : > { %v2032_v17 = vadd.f32 %v2031_v31, %v2030_v30 }
 0x40c   : > { %v2033_v38 = vrot.slane %v2032_v17, 2 }
 0x40e   : > { %v2034_v46 = vadd.f32 %v2033_v38, %v2032_v17 }
 0x410   : > { %v2035_v24 = vrot.slane %v2034_v46, 1 }
 0x412   : > { %v2036_v29 = vadd.f32 %v2035_v24, %v2034_v46 }
 0x414   : > { %3303 = vrcp.f32 %v2036_v29 }
 0x41e   : > { %v3304_v23 = vpop.eup %3303 }
 0x41f   : > { %v2038_v45 = vmul.f32 %v3304_v23, %v3288_v59  ;;  %v2039_v52 = vmul.f32 %v3304_v23, %v3290_v36  ;;  %v2040_v41 = vmul.f32 %v3304_v23, %v3292_v33  ;;  %v2041_v53 = vmul.f32 %v3304_v23, %v3294_v49 }
 0x420   : > { %v2042_v63 = vmul.f32 %v3304_v23, %v3296_v25  ;;  %v2043_v37 = vmul.f32 %v3304_v23, %v3298_v15  ;;  %v2044_v44 = vmul.f32 %v3304_v23, %v3300_v9  ;;  %v2045_v34 = vmul.f32 %v3304_v23, %v3302_v20 }
 0x421   : > { %v2046_v21 = vpack.c.bf16 %v2039_v52, %v2038_v45  ;;  %v2047_v12 = vpack.c.bf16 %v2041_v53, %v2040_v41  ;;  %v2139_v59 = vpack.c.bf16 %v4151_v60, %v4145_v3  ;;  %v4428_v36 = vpack.c.bf16 %v4079_v62, %v4077_v22 }
 0x422   : > { %v2048_v18 = vpack.c.bf16 %v2043_v37, %v2042_v63  ;;  %v2049_v54 = vpack.c.bf16 %v2045_v34, %v2044_v44  ;;  %v2140_v33 = vpack.c.bf16 %v4163_v40, %v4157_v4  ;;  %v2142_v22 = vpack.c.bf16 %v4189_v56, %v4187_v5 }
 0x423   : > { %3112 = vmatprep.subr.bf16.mxu1 %v2046_v21 }
 0x424   : > { %3113 = vmatpush3.bf16.msra.mxu1 %v2046_v21 }
 0x425   : > { %3114 = vmatprep.subr.bf16.mxu1 %v2047_v12 }
 0x428   : > { %3115 = vmatpush3.bf16.msra.mxu1 %v2047_v12 }
 0x429   : > { %3116 = vmatprep.subr.bf16.mxu1 %v2048_v18 }
 0x42c   : > { %3117 = vmatpush3.bf16.msra.mxu1 %v2048_v18 }
 0x42d   : > { %3118 = vmatprep.subr.bf16.mxu1 %v2049_v54 }
 0x430   : > { %3119 = vmatpush3.bf16.msra.mxu1 %v2049_v54 }
 0x431   : > { %3124 = vmatprep.subr.bf16.mxu1 %v4072_v28 }
 0x433   : > { %3121 = vmatmul.mubr.msk.bf16.vlgmr.msra.gmra.mrb[32].mxu1 %vm1721_vm9, %v4428_v36 }
 0x434   : > { %3125 = vmatpush3.bf16.msra.mxu1 %v4072_v28  ;;  %3128 = vmatprep.mubr.msk.bf16.mxu1 %vm908_vm0, %v2139_v59 }
 0x435   : > { %3126 = vmatprep.subr.bf16.mxu1 %v4094_v43 }
 0x438   : > { %3127 = vmatpush3.bf16.msra.mxu1 %v4094_v43 }
 0x43b   : > { %3129 = vmatmul.mubr.msk.bf16.vlgmr.msra.gmra.mrb[36].mxu1 %vm908_vm0, %v2140_v33 }
 0x43c   : > { %3132 = vmatprep.mubr.msk.bf16.mxu1 %vm908_vm0, %v2141_v16 }
 0x443   : > { %3133 = vmatmul.mubr.msk.bf16.gmra.mrb[40].mxu1 %vm908_vm0, %v2142_v22 }
 0x444   : > { %3168 = vmatprep.mubr.msk.bf16.mxu1 %vm1721_vm9, %v1606_v39 }
 0x506   : > { %v3122_v28 = vpop.f32.mrb[32].mxu1 }
 0x507   : > { %v2090_v62 = vpop.f32.mrb[33].mxu1 }
 0x508   : > { %v3123_v43 = vpop.f32.mrb[34].mxu1 }
 0x509   : > { %v4291_v3 = vpack.c.bf16 %v3123_v43, %v3122_v28  ;;  %v2093_v60 = vpop.f32.mrb[35].mxu1 }
 0x50a   : > { %v4293_v4 = vpack.c.bf16 %v2093_v60, %v2090_v62 }
 0x50e   : > { %v3130_v40 = vpop.f32.mrb[36].mxu1 }
 0x50f   : > { %v2189_v0 = vpop.f32.mrb[37].mxu1  ;;  %v2222_v56 = vsel %vm1721_vm9, %v3130_v40, -inf }
 0x510   : > { %v3131_v58 = vpop.f32.mrb[38].mxu1  ;;  %v2220_v61 = vsel %vm1721_vm9, %v2189_v0, -inf }
 0x511   : > { %v2192_v49 = vpop.f32.mrb[39].mxu1  ;;  %v2223_v2 = vsel %vm1721_vm9, %v3131_v58, -inf }
 0x512   : > { %v2221_v1 = vsel %vm1721_vm9, %v2192_v49, -inf }
 0x516   : > { %v3134_v5 = vpop.f32.mrb[40].mxu1 }
 0x517   : > { %v2228_v7 = vsel %vm1721_vm9, %v3134_v5, -inf  ;;  %v2205_v48 = vpop.f32.mrb[41].mxu1 }
 0x518   : > { %v2229_v39 = vmax.f32 %v2222_v56, %v2228_v7  ;;  %v2224_v19 = vsel %vm1721_vm9, %v2205_v48, -inf  ;;  %v3135_v25 = vpop.f32.mrb[42].mxu1 }
 0x519   : > { %v2225_v35 = vmax.f32 %v2220_v61, %v2224_v19  ;;  %v2230_v15 = vsel %vm1721_vm9, %v3135_v25, -inf  ;;  %v2208_v14 = vpop.f32.mrb[43].mxu1 }
 0x51a   : > { %v2231_v9 = vmax.f32 %v2223_v2, %v2230_v15  ;;  %v2226_v26 = vsel %vm1721_vm9, %v2208_v14, -inf }
 0x51b   : > { %v2227_v50 = vmax.f32 %v2221_v1, %v2226_v26 }
 0x51c   : > { %v2233_v20 = vmax.f32 %v2229_v39, %v2231_v9 }
 0x51d   : > { %v2232_v13 = vmax.f32 %v2225_v35, %v2227_v50 }
 0x51f   : > { %v2234_v51 = vmax.f32 %v2232_v13, %v2233_v20 }
 0x521   : > { %v2235_v6 = vrot.slane %v2234_v51, 4 }
 0x523   : > { %v2236_v57 = vmax.f32 %v2234_v51, %v2235_v6 }
 0x525   : > { %v2237_v30 = vrot.slane %v2236_v57, 2 }
 0x527   : > { %v2238_v31 = vmax.f32 %v2236_v57, %v2237_v30 }
 0x529   : > { %v2239_v17 = vrot.slane %v2238_v31, 1 }
 0x52b   : > { %v2240_v38 = vmax.f32 %v2238_v31, %v2239_v17 }
 0x52d   : > { %v2241_v46 = vsub.f32 %v2189_v0, %v2240_v38  ;;  %v2242_v24 = vsub.f32 %v2192_v49, %v2240_v38  ;;  %v2243_v29 = vsub.f32 %v3130_v40, %v2240_v38  ;;  %v2244_v23 = vsub.f32 %v3131_v58, %v2240_v38 }
 0x52e   : > { %v2245_v45 = vsub.f32 %v2205_v48, %v2240_v38  ;;  %v2246_v52 = vsub.f32 %v2208_v14, %v2240_v38  ;;  %v2247_v41 = vsub.f32 %v3134_v5, %v2240_v38  ;;  %v2248_v53 = vsub.f32 %v3135_v25, %v2240_v38 }
 0x52f   : > { %v2249_v63 = vmul.f32 1.442695, %v2241_v46  ;;  %v2251_v37 = vmul.f32 1.442695, %v2242_v24  ;;  %v2253_v44 = vmul.f32 1.442695, %v2243_v29 }
 0x530   : > { %v2255_v34 = vmul.f32 1.442695, %v2244_v23  ;;  %v2257_v21 = vmul.f32 1.442695, %v2245_v45  ;;  %v2259_v12 = vmul.f32 1.442695, %v2246_v52  ;;  %v4429_v45 = vpack.c.bf16 %v4112_v47, %v4109_v8 }
 0x531   : > { %3305 = vpow2.f32 %v2249_v63  ;;  %v2261_v18 = vmul.f32 1.442695, %v2247_v41  ;;  %v2263_v54 = vmul.f32 1.442695, %v2248_v53  ;;  %v4430_v52 = vld [vmem:[#allocation11_spill] sm:$0xff]  ;;  %v4431_v41 = vld [vmem:[#allocation10_spill] sm:$0xff] }
 0x532   : > { %3307 = vpow2.f32 %v2251_v37  ;;  %v4432_v53 = vpack.c.bf16 %v4430_v52, %v4431_v41  ;;  %v4433_v63 = vld [vmem:[#allocation13_spill] sm:$0xff]  ;;  %v4434_v37 = vld [vmem:[#allocation12_spill] sm:$0xff]  ;;  %v4436_v8 = vld [vmem:[#allocation15_spill] sm:$0xff] }
 0x533   : > { %3309 = vpow2.f32 %v2253_v44  ;;  %v4435_v44 = vpack.c.bf16 %v4433_v63, %v4434_v37  ;;  %v4437_v47 = vld [vmem:[#allocation14_spill] sm:$0xff] }
 0x534   : > { %3311 = vpow2.f32 %v2255_v34  ;;  %v4438_v34 = vpack.c.bf16 %v4436_v8, %v4437_v47 }
 0x535   : > { %3313 = vpow2.f32 %v2257_v21 }
 0x536   : > { %3315 = vpow2.f32 %v2259_v12 }
 0x537   : > { %3317 = vpow2.f32 %v2261_v18 }
 0x538   : > { %3319 = vpow2.f32 %v2263_v54 }
 0x53b   : > { %v3306_v59 = vpop.eup %3305 }
 0x53c   : > { %v3308_v36 = vpop.eup %3307  ;;  %v2265_v33 = vsel %vm1721_vm9, %v3306_v59, 0.0 }
 0x53d   : > { %v3310_v16 = vpop.eup %3309  ;;  %v2266_v22 = vsel %vm1721_vm9, %v3308_v36, 0.0 }
 0x53e   : > { %v3312_v28 = vpop.eup %3311  ;;  %v2267_v62 = vadd.f32 %v2266_v22, %v2265_v33  ;;  %v2268_v43 = vsel %vm1721_vm9, %v3310_v16, 0.0 }
 0x53f   : > { %v3314_v60 = vpop.eup %3313  ;;  %v2270_v0 = vsel %vm1721_vm9, %v3312_v28, 0.0 }
 0x540   : > { %v2269_v40 = vadd.f32 %v2268_v43, %v2267_v62  ;;  %v3316_v58 = vpop.eup %3315  ;;  %v2272_v5 = vsel %vm1721_vm9, %v3314_v60, 0.0 }
 0x541   : > { %v3318_v56 = vpop.eup %3317  ;;  %v2274_v48 = vsel %vm1721_vm9, %v3316_v58, 0.0 }
 0x542   : > { %v2271_v49 = vadd.f32 %v2270_v0, %v2269_v40  ;;  %v3320_v61 = vpop.eup %3319  ;;  %v2276_v19 = vsel %vm1721_vm9, %v3318_v56, 0.0 }
 0x543   : > { %v2278_v2 = vsel %vm1721_vm9, %v3320_v61, 0.0 }
 0x544   : > { %v2273_v7 = vadd.f32 %v2272_v5, %v2271_v49 }
 0x546   : > { %v2275_v39 = vadd.f32 %v2274_v48, %v2273_v7 }
 0x548   : > { %v2277_v25 = vadd.f32 %v2276_v19, %v2275_v39 }
 0x54a   : > { %v2279_v35 = vadd.f32 %v2278_v2, %v2277_v25 }
 0x54c   : > { %v2280_v15 = vrot.slane %v2279_v35, 4 }
 0x54e   : > { %v2281_v14 = vadd.f32 %v2280_v15, %v2279_v35 }
 0x550   : > { %v2282_v1 = vrot.slane %v2281_v14, 2 }
 0x552   : > { %v2283_v9 = vadd.f32 %v2282_v1, %v2281_v14 }
 0x554   : > { %v2284_v26 = vrot.slane %v2283_v9, 1 }
 0x556   : > { %v2285_v50 = vadd.f32 %v2284_v26, %v2283_v9 }
 0x558   : > { %3321 = vrcp.f32 %v2285_v50 }
 0x562   : > { %v3322_v20 = vpop.eup %3321 }
 0x563   : > { %v2287_v13 = vmul.f32 %v3322_v20, %v3306_v59  ;;  %v2288_v51 = vmul.f32 %v3322_v20, %v3308_v36  ;;  %v2289_v6 = vmul.f32 %v3322_v20, %v3310_v16  ;;  %v2290_v57 = vmul.f32 %v3322_v20, %v3312_v28 }
 0x564   : > { %v2291_v30 = vmul.f32 %v3322_v20, %v3314_v60  ;;  %v2292_v31 = vmul.f32 %v3322_v20, %v3316_v58  ;;  %v2293_v17 = vmul.f32 %v3322_v20, %v3318_v56  ;;  %v2294_v38 = vmul.f32 %v3322_v20, %v3320_v61 }
 0x565   : > { %v2295_v46 = vpack.c.bf16 %v2288_v51, %v2287_v13  ;;  %v2296_v24 = vpack.c.bf16 %v2290_v57, %v2289_v6 }
 0x566   : > { %v2297_v29 = vpack.c.bf16 %v2292_v31, %v2291_v30  ;;  %v2298_v23 = vpack.c.bf16 %v2294_v38, %v2293_v17 }
 0x567   : > { %3136 = vmatprep.subr.bf16.mxu0 %v2295_v46 }
 0x568   : > { %3137 = vmatpush3.bf16.msra.mxu0 %v2295_v46 }
 0x569   : > { %3138 = vmatprep.subr.bf16.mxu0 %v2296_v24 }
 0x56c   : > { %3139 = vmatpush3.bf16.msra.mxu0 %v2296_v24 }
 0x56d   : > { %3140 = vmatprep.subr.bf16.mxu0 %v2297_v29 }
 0x570   : > { %3141 = vmatpush3.bf16.msra.mxu0 %v2297_v29 }
 0x571   : > { %3142 = vmatprep.subr.bf16.mxu0 %v2298_v23 }
 0x574   : > { %3143 = vmatpush3.bf16.msra.mxu0 %v2298_v23 }
 0x575   : > { %3148 = vmatprep.subr.bf16.mxu0 %v4106_v42 }
 0x577   : > { %3145 = vmatmul.mubr.msk.bf16.vlgmr.msra.gmra.mrb[36].mxu0 %vm1721_vm9, %v4429_v45 }
 0x578   : > { %3149 = vmatpush3.bf16.msra.mxu0 %v4106_v42  ;;  %3152 = vmatprep.mubr.msk.bf16.mxu0 %vm908_vm0, %v4432_v53  ;;  %v4439_v42 = vld [vmem:[#allocation17_spill] sm:$0xff] }
 0x579   : > { %3150 = vmatprep.subr.bf16.mxu0 %v4193_v11 }
 0x57c   : > { %3151 = vmatpush3.bf16.msra.mxu0 %v4193_v11  ;;  %v4440_v11 = vld [vmem:[#allocation16_spill] sm:$0xff] }
 0x57d   : > { %3172 = vmatprep.subr.bf16.mxu0 %v4249_v55  ;;  %v4441_v21 = vpack.c.bf16 %v4439_v42, %v4440_v11 }
 0x57f   : > { %3153 = vmatmul.mubr.msk.bf16.vlgmr.msra.gmra.mrb[40].mxu0 %vm908_vm0, %v4435_v44 }
 0x580   : > { %3156 = vmatprep.mubr.msk.bf16.mxu0 %vm908_vm0, %v4438_v34  ;;  %3173 = vmatpush3.bf16.msra.mxu0 %v4249_v55 }
 0x581   : > { %3174 = vmatprep.subr.bf16.mxu0 %v4247_v32 }
 0x584   : > { %3175 = vmatpush3.bf16.msra.mxu0 %v4247_v32 }
 0x585   : > { %3176 = vmatprep.subr.bf16.mxu0 %v4293_v4 }
 0x587   : > { %3157 = vmatmul.mubr.msk.bf16.gmra.mrb[44].mxu0 %vm908_vm0, %v4441_v21 }
 0x588   : > { %3177 = vmatpush3.bf16.msra.mxu0 %v4293_v4 }
 0x589   : > { %3178 = vmatprep.subr.bf16.mxu0 %v4291_v3 }
 0x58c   : > { %3179 = vmatpush3.bf16.msra.mxu0 %v4291_v3 }
 0x64a   : > { %v3146_v12 = vpop.f32.mrb[36].mxu0 }
 0x64b   : > { %v2339_v18 = vpop.f32.mrb[37].mxu0 }
 0x64c   : > { %v3147_v55 = vpop.f32.mrb[38].mxu0 }
 0x64d   : > { %v2355_v54 = vpack.c.bf16 %v3147_v55, %v3146_v12  ;;  %v2342_v59 = vpop.f32.mrb[39].mxu0 }
 0x64e   : > { %v2354_v36 = vpack.c.bf16 %v2342_v59, %v2339_v18 }
 0x650   : > { %3180 = vmatprep.subr.bf16.mxu0 %v2354_v36 }
 0x651   : > { %3181 = vmatpush3.bf16.msra.mxu0 %v2354_v36 }
 0x652   : > { %v3154_v32 = vpop.f32.mrb[40].mxu0  ;;  %3182 = vmatprep.subr.bf16.mxu0 %v2355_v54 }
 0x653   : > { %v2438_v33 = vpop.f32.mrb[41].mxu0  ;;  %v2471_v4 = vsel %vm1721_vm9, %v3154_v32, -inf }
 0x654   : > { %v3155_v16 = vpop.f32.mrb[42].mxu0  ;;  %v2469_v43 = vsel %vm1721_vm9, %v2438_v33, -inf }
 0x655   : > { %v2441_v22 = vpop.f32.mrb[43].mxu0  ;;  %3183 = vmatpush3.bf16.msra.mxu0 %v2355_v54  ;;  %v2472_v58 = vsel %vm1721_vm9, %v3155_v16, -inf }
 0x656   : > { %v2470_v7 = vsel %vm1721_vm9, %v2441_v22, -inf }
 0x65a   : > { %v3158_v28 = vpop.f32.mrb[44].mxu0 }
 0x65b   : > { %v2477_v62 = vsel %vm1721_vm9, %v3158_v28, -inf  ;;  %v2454_v3 = vpop.f32.mrb[45].mxu0 }
 0x65c   : > { %v2478_v60 = vmax.f32 %v2471_v4, %v2477_v62  ;;  %v2473_v40 = vsel %vm1721_vm9, %v2454_v3, -inf  ;;  %v3159_v0 = vpop.f32.mrb[46].mxu0 }
 0x65d   : > { %v2474_v49 = vmax.f32 %v2469_v43, %v2473_v40  ;;  %v2479_v5 = vsel %vm1721_vm9, %v3159_v0, -inf  ;;  %v2457_v56 = vpop.f32.mrb[47].mxu0 }
 0x65e   : > { %v2480_v48 = vmax.f32 %v2472_v58, %v2479_v5  ;;  %v2475_v61 = vsel %vm1721_vm9, %v2457_v56, -inf }
 0x65f   : > { %v2476_v39 = vmax.f32 %v2470_v7, %v2475_v61 }
 0x660   : > { %v2482_v19 = vmax.f32 %v2478_v60, %v2480_v48 }
 0x661   : > { %v2481_v25 = vmax.f32 %v2474_v49, %v2476_v39 }
 0x663   : > { %v2483_v2 = vmax.f32 %v2481_v25, %v2482_v19 }
 0x665   : > { %v2484_v35 = vrot.slane %v2483_v2, 4 }
 0x667   : > { %v2485_v15 = vmax.f32 %v2483_v2, %v2484_v35 }
 0x669   : > { %v2486_v14 = vrot.slane %v2485_v15, 2 }
 0x66b   : > { %v2487_v1 = vmax.f32 %v2485_v15, %v2486_v14  ;;  %v4442_v14 = vpack.c.bf16 %v4199_v10, %v4196_v27  ;;  %v3268_v27 = vld [vmem:[%s4391_s7 + $0x8] sm:$0xff]   ;;  %v2681_v10 = vpop.permute.xlu1 %2680 }
 0x66d   : > { %v2488_v9 = vrot.slane %v2487_v1, 1 }
 0x66f   : > { %v2489_v26 = vmax.f32 %v2487_v1, %v2488_v9  ;;  %v3267_v1 = vld [vmem:[%s4391_s7] sm:$0xff]  }
 0x670   : > { %3188 = vmatprep.mubr.bf16.mxu0 %v3267_v1 }
 0x671   : > { %v2490_v50 = vsub.f32 %v2438_v33, %v2489_v26  ;;  %v2491_v20 = vsub.f32 %v2441_v22, %v2489_v26  ;;  %v2492_v13 = vsub.f32 %v3154_v32, %v2489_v26  ;;  %v2493_v51 = vsub.f32 %v3155_v16, %v2489_v26 }
 0x672   : > { %v2494_v6 = vsub.f32 %v2454_v3, %v2489_v26  ;;  %v2495_v57 = vsub.f32 %v2457_v56, %v2489_v26  ;;  %v2496_v30 = vsub.f32 %v3158_v28, %v2489_v26  ;;  %v2497_v31 = vsub.f32 %v3159_v0, %v2489_v26 }
 0x673   : > { %v2498_v17 = vmul.f32 1.442695, %v2490_v50  ;;  %v2500_v38 = vmul.f32 1.442695, %v2491_v20  ;;  %v2502_v46 = vmul.f32 1.442695, %v2492_v13 }
 0x674   : > { %v2504_v24 = vmul.f32 1.442695, %v2493_v51  ;;  %v2506_v29 = vmul.f32 1.442695, %v2494_v6  ;;  %v2508_v23 = vmul.f32 1.442695, %v2495_v57  ;;  %v2686_v6 = vpop.permute.xlu1 %2685 }
 0x675   : > { %3323 = vpow2.f32 %v2498_v17  ;;  %v2510_v45 = vmul.f32 1.442695, %v2496_v30  ;;  %v2512_v52 = vmul.f32 1.442695, %v2497_v31  ;;  %v4443_v31 = vld [vmem:[#allocation8_spill] sm:$0xff] }
 0x676   : > { %3325 = vpow2.f32 %v2500_v38 }
 0x677   : > { %3327 = vpow2.f32 %v2502_v46  ;;  %v4444_v46 = vld [vmem:[#allocation6_spill] sm:$0xff] }
 0x678   : > { %3329 = vpow2.f32 %v2504_v24  ;;  %v2691_v57 = vpop.permute.xlu1 %2690 }
 0x679   : > { %3331 = vpow2.f32 %v2506_v29 }
 0x67a   : > { %3333 = vpow2.f32 %v2508_v23 }
 0x67b   : > { %3335 = vpow2.f32 %v2510_v45  ;;  %v4445_v45 = vld [vmem:[#allocation9_spill] sm:$0xff] }
 0x67c   : > { %3337 = vpow2.f32 %v2512_v52 }
 0x67f   : > { %v3324_v41 = vpop.eup %3323 }
 0x680   : > { %v3326_v53 = vpop.eup %3325  ;;  %v2514_v63 = vsel %vm1721_vm9, %v3324_v41, 0.0 }
 0x681   : > { %v3328_v37 = vpop.eup %3327  ;;  %v2515_v44 = vsel %vm1721_vm9, %v3326_v53, 0.0 }
 0x682   : > { %v3330_v8 = vpop.eup %3329  ;;  %v2516_v47 = vadd.f32 %v2515_v44, %v2514_v63  ;;  %v2517_v34 = vsel %vm1721_vm9, %v3328_v37, 0.0 }
 0x683   : > { %v3332_v42 = vpop.eup %3331  ;;  %v2519_v21 = vsel %vm1721_vm9, %v3330_v8, 0.0 }
 0x684   : > { %v2518_v11 = vadd.f32 %v2517_v34, %v2516_v47  ;;  %v3334_v12 = vpop.eup %3333  ;;  %v2521_v55 = vsel %vm1721_vm9, %v3332_v42, 0.0 }
 0x685   : > { %v3336_v54 = vpop.eup %3335  ;;  %v2523_v36 = vsel %vm1721_vm9, %v3334_v12, 0.0 }
 0x686   : > { %v2520_v18 = vadd.f32 %v2519_v21, %v2518_v11  ;;  %v3338_v32 = vpop.eup %3337  ;;  %v2525_v16 = vsel %vm1721_vm9, %v3336_v54, 0.0 }
 0x687   : > { %v2527_v28 = vsel %vm1721_vm9, %v3338_v32, 0.0 }
 0x688   : > { %v2522_v59 = vadd.f32 %v2521_v55, %v2520_v18 }
 0x68a   : > { %v2524_v33 = vadd.f32 %v2523_v36, %v2522_v59 }
 0x68c   : > { %v2526_v22 = vadd.f32 %v2525_v16, %v2524_v33 }
 0x68e   : > { %v2528_v4 = vadd.f32 %v2527_v28, %v2526_v22 }
 0x690   : > { %v2529_v62 = vrot.slane %v2528_v4, 4 }
 0x692   : > { %v2530_v3 = vadd.f32 %v2529_v62, %v2528_v4 }
 0x694   : > { %v2531_v43 = vrot.slane %v2530_v3, 2 }
 0x696   : > { %v2532_v60 = vadd.f32 %v2531_v43, %v2530_v3 }
 0x698   : > { %v2533_v40 = vrot.slane %v2532_v60, 1 }
 0x69a   : > { %v2534_v0 = vadd.f32 %v2533_v40, %v2532_v60 }
 0x69c   : > { %3339 = vrcp.f32 %v2534_v0 }
 0x6a6   : > { %v3340_v58 = vpop.eup %3339 }
 0x6a7   : > { %v2536_v49 = vmul.f32 %v3340_v58, %v3324_v41  ;;  %v2537_v5 = vmul.f32 %v3340_v58, %v3326_v53  ;;  %v2538_v56 = vmul.f32 %v3340_v58, %v3328_v37  ;;  %v2539_v7 = vmul.f32 %v3340_v58, %v3330_v8  ;;  %v2696_v53 = vpop.permute.xlu1 %2695  ;;  %v4446_v37 = vld [vmem:[#allocation7_spill] sm:$0xff] }
 0x6a8   : > { %v2540_v48 = vmul.f32 %v3340_v58, %v3332_v42  ;;  %v2541_v61 = vmul.f32 %v3340_v58, %v3334_v12  ;;  %v2542_v39 = vmul.f32 %v3340_v58, %v3336_v54  ;;  %v2543_v19 = vmul.f32 %v3340_v58, %v3338_v32 }
 0x6a9   : > { %v2544_v25 = vpack.c.bf16 %v2537_v5, %v2536_v49  ;;  %v2545_v2 = vpack.c.bf16 %v2539_v7, %v2538_v56 }
 0x6aa   : > { %v2546_v35 = vpack.c.bf16 %v2541_v61, %v2540_v48  ;;  %v2547_v15 = vpack.c.bf16 %v2543_v19, %v2542_v39 }
 0x6ab   : > { %3160 = vmatprep.subr.bf16.mxu1 %v2544_v25 }
 0x6ac   : > { %3161 = vmatpush3.bf16.msra.mxu1 %v2544_v25 }
 0x6ad   : > { %3162 = vmatprep.subr.bf16.mxu1 %v2545_v2 }
 0x6b0   : > { %3163 = vmatpush3.bf16.msra.mxu1 %v2545_v2 }
 0x6b1   : > { %3164 = vmatprep.subr.bf16.mxu1 %v2546_v35 }
 0x6b4   : > { %3165 = vmatpush3.bf16.msra.mxu1 %v2546_v35 }
 0x6b5   : > { %3166 = vmatprep.subr.bf16.mxu1 %v2547_v15 }
 0x6b8   : > { %3167 = vmatpush3.bf16.msra.mxu1 %v2547_v15 }
 0x6bb   : > { %3169 = vmatmul.mubr.msk.bf16.vlgmr.msra.gmra.mrb[44].mxu1 %vm1721_vm9, %v4442_v14 }
 0x78e   : > { %v3170_v9 = vpop.f32.mrb[44].mxu1 }
 0x78f   : > { %v2588_v26 = vpop.f32.mrb[45].mxu1 }
 0x790   : > { %v3171_v50 = vpop.f32.mrb[46].mxu1 }
 0x791   : > { %v2604_v20 = vpack.c.bf16 %v3171_v50, %v3170_v9  ;;  %v2591_v13 = vpop.f32.mrb[47].mxu1 }
 0x792   : > { %v2603_v51 = vpack.c.bf16 %v2591_v13, %v2588_v26 }
 0x794   : > { %3184 = vmatprep.subr.bf16.mxu0 %v2603_v51 }
 0x795   : > { %3185 = vmatpush3.bf16.msra.mxu0 %v2603_v51 }
 0x796   : > { %3186 = vmatprep.subr.bf16.mxu0 %v2604_v20 }
 0x799   : > { %3187 = vmatpush3.bf16.msra.mxu0 %v2604_v20 }
 0x79c   : > { %3189 = vmatmul.mubr.bf16.vlgmr.msra.gmra.mrb[48].mxu0 %v3268_v27 }
 0x86f   : > { %v3190_v30 = vpop.f32.mrb[48].mxu0 }
 0x870   : > { %v2672_v17 = vadd.f32 %v3190_v30, %v4443_v31  ;;  %v2655_v38 = vpop.f32.mrb[49].mxu0 }
 0x871   : > { %v2670_v24 = vadd.f32 %v2655_v38, %v4444_v46  ;;  %v3191_v29 = vpop.f32.mrb[50].mxu0 }
 0x872   : > { %v2700_v23 = vadd.f32 %v2691_v57, %v2672_v17  ;;  %v2673_v52 = vadd.f32 %v3191_v29, %v4445_v45  ;;  %v2658_v41 = vpop.f32.mrb[51].mxu0 }
 0x873   : > { %v2698_v63 = vadd.f32 %v2681_v10, %v2670_v24  ;;  %v2671_v44 = vadd.f32 %v2658_v41, %v4446_v37 }
 0x874   : > { %2704 = vst.msk [vmem:[%s448_s27 + $0x10] sm:$0xff] %vm1721_vm9, %v2700_v23  ;;  %v2701_v8 = vadd.f32 %v2696_v53, %v2673_v52 }
 0x875   : > { %2702 = vst.msk [vmem:[%s448_s27] sm:$0xff] %vm1721_vm9, %v2698_v63  ;;  %v2699_v47 = vadd.f32 %v2686_v6, %v2671_v44 }
 0x876   : > { %2705 = vst.msk [vmem:[%s448_s27 + $0x18] sm:$0xff] %vm1721_vm9, %v2701_v8 }
 0x877   : > { %2703 = vst.msk [vmem:[%s448_s27 + $0x8] sm:$0xff] %vm1721_vm9, %v2699_v47 }
 0x878 PF: > { %s24_s23 = sadd.s32 1, %s3366_s23  }
 0x879   : > { %p21_p1 = scmp.ge.s32.totalorder %s24_s23, 4  }
 0x87b   :  { %23 = sbr.rel (!%p21_p1) target bundleno = 3 (0x3), region = 109 }
 0x882   :  { %2727 = vsyncpa [#allocation4], 1 }
 0x883   :  { %2729 = vsyncpa [#allocation4 + $0x1], 1 }

</bundles_post_ra>
